<compile_context>
chip_gen: v6e
topology: v6e:2x2x1
jax: 0.10.0
libtpu: 0.0.40
codegen_flags: <defaults>
</compile_context>

<pallas_src>
import functools

import jax
import jax.numpy as jnp
from jax.experimental import pallas as pl
from jax.experimental.pallas import tpu as pltpu

TN = 256   # node-tile rows   (multiple of 8)
TE = 512   # edge-block rows  (multiple of 128: it is the lane dim of dst_p)
H_LANES = 128


def gcn_conv_kernel(eblk_start_ref, eblk_count_ref,              # scalar prefetch (SMEM)
                    dst_ref, enorm_ref, xlin_src_ref, eemb_ref,  # edge-block inputs
                    xlin_ref, dinv_ref, root_ref,                # node tile + full-block
                    out_ref,
                    acc_ref, *, tn, te):
    """Fused GCNConv: edge messages + masked segment-sum + root term."""
    i = pl.program_id(0)            # node tile
    k = pl.program_id(1)            # edge block within this tile (reduction axis)

    @pl.when(k == 0)
    def _init():
        acc_ref[...] = jnp.zeros_like(acc_ref)

    @pl.when(k < eblk_count_ref[i])
    def _accumulate():
        # Edge messages in f32: relu(x_lin[src] + bond_emb) scaled by
        # norm[src]*norm[dst] (norm applied in f32, before the bf16 MXU cast).
        msg = jnp.maximum(xlin_src_ref[...].astype(jnp.float32)
                          + eemb_ref[...].astype(jnp.float32), 0.0)      # (te, H)
        msg = msg * enorm_ref[...]                                       # (te,1) bcast

        # Exact {0,1} scatter mask for this node tile:
        #   scat[n, e] = 1  iff  dst_e == tile_start + n.
        # Padded edges carry the sentinel dst == n_pad, which never matches.
        local_dst = dst_ref[...] - i * tn                                # (1, te)
        row_ids = jax.lax.broadcasted_iota(jnp.int32, (tn, te), 0)       # (tn, te)
        scat = (row_ids == local_dst).astype(jnp.bfloat16)

        acc_ref[...] += jnp.dot(scat, msg.astype(jnp.bfloat16),
                                preferred_element_type=jnp.float32)

    @pl.when(k == pl.num_programs(1) - 1)
    def _finalize():
        root = jnp.maximum(xlin_ref[...] + root_ref[...], 0.0) * dinv_ref[...]
        out_ref[...] = (acc_ref[...] + root).astype(out_ref.dtype)


def gcn_conv(x, src, dst, edge_emb, w, b, root_emb, *, max_edge_blocks=None):
    """GCNConv forward.
    x:(N,H) f32, src/dst:(E,) int32, edge_emb:(E,H) f32,
    w:(H,H) laid out as in_features x out_features, b:(H,), root_emb:(H,)."""
    N, H = x.shape
    E = src.shape[0]
    assert H == H_LANES, "kernel is specialized for a lane-dense hidden dim of 128"

    # ---- glue: degrees / normalization --------------------------------------
    deg = jnp.zeros((N,), jnp.float32).at[src].add(1.0) + 1.0     # out_degree + 1
    norm = jax.lax.rsqrt(deg)
    dinv = 1.0 / deg

    # ---- glue: node linear ONCE, sort edges by dst, gather x_lin rows --------
    x_lin = x @ w + b                                              # (N, H) f32
    order = jnp.argsort(dst)
    src_s, dst_s = src[order], dst[order]
    eemb_s = edge_emb[order]
    enorm_s = norm[src_s] * norm[dst_s]
    xlin_src_s = x_lin[src_s]                                      # row gather (XLA)

    # ---- padding to tile multiples -------------------------------------------
    n_tiles = pl.cdiv(N, TN)
    n_pad = n_tiles * TN
    neb = max(pl.cdiv(E, TE), 1)
    e_pad = neb * TE

    xlin_p = jnp.zeros((n_pad, H), jnp.float32).at[:N].set(x_lin)
    dinv_p = jnp.zeros((n_pad, 1), jnp.float32).at[:N, 0].set(dinv)
    # edge streams go bf16 over HBM (half the DMA bytes); norm stays f32
    xlin_src_p = jnp.zeros((e_pad, H), jnp.bfloat16).at[:E].set(
        xlin_src_s.astype(jnp.bfloat16))
    eemb_p = jnp.zeros((e_pad, H), jnp.bfloat16).at[:E].set(
        eemb_s.astype(jnp.bfloat16))
    # sentinel dst = n_pad never matches any node id in [0, n_pad), so padded
    # edge rows can never be scattered into a real node (load-bearing invariant).
    dst_p = jnp.full((1, e_pad), n_pad, jnp.int32).at[0, :E].set(dst_s)
    enorm_p = jnp.zeros((e_pad, 1), jnp.float32).at[:E, 0].set(enorm_s)

    # ---- per-node-tile edge-block offsets / counts, computed ON DEVICE -------
    tile_bounds = jnp.arange(n_tiles + 1, dtype=jnp.int32) * TN
    pos = jnp.searchsorted(dst_s, tile_bounds, side="left").astype(jnp.int32)
    lo, hi = pos[:-1], pos[1:]
    has_edges = hi > lo
    eblk_start = jnp.where(has_edges, lo // TE, 0).astype(jnp.int32)
    eblk_count = jnp.where(has_edges, (hi - 1) // TE - lo // TE + 1, 0).astype(jnp.int32)

    # Grid extent along the reduction axis must be static.  One scalar readback,
    # bucketed to a power of two (capped at the total block count) so distinct
    # graphs of similar skew hit the same compiled kernel.
    if max_edge_blocks is None:
        kb = max(int(jnp.max(eblk_count)), 1)
        kb = min(int(pl.next_power_of_2(kb)), neb)
    else:
        kb = int(max_edge_blocks)

    # ---- BlockSpecs -----------------------------------------------------------
    def eidx_rows(i, k, s_ref, c_ref):        # (e_pad, *) edge arrays
        last = s_ref[i] + jnp.maximum(c_ref[i] - 1, 0)
        return (jnp.minimum(s_ref[i] + k, last), 0)

    def eidx_cols(i, k, s_ref, c_ref):        # (1, e_pad) dst array
        last = s_ref[i] + jnp.maximum(c_ref[i] - 1, 0)
        return (0, jnp.minimum(s_ref[i] + k, last))

    def nidx(i, k, s_ref, c_ref):             # node-tile arrays / output
        return (i, 0)

    def widx(i, k, s_ref, c_ref):             # full-block root embedding
        return (0, 0)

    kernel = functools.partial(gcn_conv_kernel, tn=TN, te=TE)
    out = pl.pallas_call(
        kernel,
        out_shape=jax.ShapeDtypeStruct((n_pad, H), jnp.float32),
        grid_spec=pltpu.PrefetchScalarGridSpec(
            num_scalar_prefetch=2,
            grid=(n_tiles, kb),
            in_specs=[
                pl.BlockSpec((1, TE), eidx_cols),     # dst     (sorted, sentinel-padded)
                pl.BlockSpec((TE, 1), eidx_rows),     # norm[src]*norm[dst]  (f32 column)
                pl.BlockSpec((TE, H), eidx_rows),     # x_lin[src]           (bf16)
                pl.BlockSpec((TE, H), eidx_rows),     # bond embedding       (bf16)
                pl.BlockSpec((TN, H), nidx),          # x_lin node tile      (f32)
                pl.BlockSpec((TN, 1), nidx),          # 1 / deg node tile
                pl.BlockSpec((1, H), widx),           # root_emb
            ],
            out_specs=pl.BlockSpec((TN, H), nidx),
            scratch_shapes=[pltpu.VMEM((TN, H), jnp.float32)],   # segment-sum accumulator
        ),
        compiler_params=pltpu.CompilerParams(
            dimension_semantics=("parallel", "arbitrary"),
            vmem_limit_bytes=32 * 1024 * 1024),
    )(eblk_start, eblk_count,
      dst_p, enorm_p, xlin_src_p, eemb_p, xlin_p, dinv_p,
      root_emb.reshape(1, H))
    return out[:N]


def gcn_conv_forward(params, x, src, dst, edge_cat):
    # BondEncoder: sum of per-column embedding lookups (glue; table gather).
    edge_emb = sum(tbl[edge_cat[:, i]] for i, tbl in enumerate(params["bond_tables"]))
    return gcn_conv(x, src, dst, edge_emb,
                    params["w"], params["b"], params["root_emb"])


def gcn_conv_reference(params, x, src, dst, edge_cat):
    """Pure-jnp f32 reference matching the PyTorch GCNConv forward."""
    N = x.shape[0]
    edge_emb = sum(tbl[edge_cat[:, i]] for i, tbl in enumerate(params["bond_tables"]))
    deg = jnp.zeros((N,), jnp.float32).at[src].add(1.0) + 1.0
    norm = deg ** -0.5
    x_lin = x @ params["w"] + params["b"]
    msg = (norm[src, None] * norm[dst, None]
           * jnp.maximum(x_lin[src] + edge_emb, 0.0))
    agg = jax.ops.segment_sum(msg, dst, num_segments=N)
    return agg + jnp.maximum(x_lin + params["root_emb"], 0.0) / deg[:, None]


if __name__ == "__main__":
    key = jax.random.PRNGKey(0)
    ks = iter(jax.random.split(key, 32))

    # Small graph, but sized to exercise 2 node tiles x 2 edge blocks.
    N, E, H = 300, 700, 128
    n_bond_feats, bond_vocab = 2, 4

    src = jax.random.randint(next(ks), (E,), 0, N, dtype=jnp.int32)
    dst = jax.random.randint(next(ks), (E,), 0, N, dtype=jnp.int32)
    x = jax.random.normal(next(ks), (N, H), jnp.float32)
    edge_cat = jax.random.randint(next(ks), (E, n_bond_feats), 0, bond_vocab)

    params = dict(
        w=0.1 * jax.random.normal(next(ks), (H, H), jnp.float32),
        b=0.1 * jax.random.normal(next(ks), (H,), jnp.float32),
        root_emb=0.1 * jax.random.normal(next(ks), (H,), jnp.float32),
        bond_tables=[0.1 * jax.random.normal(next(ks), (bond_vocab, H), jnp.float32)
                     for _ in range(n_bond_feats)],
    )

    out = gcn_conv_forward(params, x, src, dst, edge_cat)
    out = jax.block_until_ready(out)

    ref = gcn_conv_reference(params, x, src, dst, edge_cat)
    assert out.shape == (N, H)
    # bf16 edge streams / bf16 MXU operands vs f32 reference -> loose tolerance.
    max_err = float(jnp.max(jnp.abs(out - ref)))
    assert jnp.allclose(out, ref, atol=5e-2, rtol=5e-2), max_err

    print("KERNEL_OK")
</pallas_src>

<mosaic_0001>
module attributes {stable_mosaic.version = 11 : i64} {
  func.func @gcn_conv_kernel(%arg0: i32, %arg1: i32, %arg2: memref<2xi32, #tpu.memory_space<smem>>, %arg3: memref<2xi32, #tpu.memory_space<smem>>, %arg4: memref<1x512xi32, #tpu.memory_space<vmem>>, %arg5: memref<512x1xf32, #tpu.memory_space<vmem>>, %arg6: memref<512x128xbf16, #tpu.memory_space<vmem>>, %arg7: memref<512x128xbf16, #tpu.memory_space<vmem>>, %arg8: memref<256x128xf32, #tpu.memory_space<vmem>>, %arg9: memref<256x1xf32, #tpu.memory_space<vmem>>, %arg10: memref<1x128xf32, #tpu.memory_space<vmem>>, %arg11: memref<256x128xf32, #tpu.memory_space<vmem>>, %arg12: memref<256x128xf32, #tpu.memory_space<vmem>>) attributes {dimension_semantics = [#tpu.dimension_semantics<parallel>, #tpu.dimension_semantics<arbitrary>], iteration_bounds = array<i64: 2, 2>, scalar_prefetch = 2 : i64, scratch_operands = 1 : i64, tpu.core_type = #tpu.core_type<tc>, window_params = [{transform_indices = @transform_0, window_bounds = array<i64: 1, 512>}, {transform_indices = @transform_1, window_bounds = array<i64: 512, 1>}, {transform_indices = @transform_2, window_bounds = array<i64: 512, 128>}, {transform_indices = @transform_3, window_bounds = array<i64: 512, 128>}, {transform_indices = @transform_4, window_bounds = array<i64: 256, 128>}, {transform_indices = @transform_5, window_bounds = array<i64: 256, 1>}, {pipeline_mode = #tpu.pipeline_mode<synchronous>, transform_indices = @transform_6, window_bounds = array<i64: 1, 128>}, {transform_indices = @transform_7, window_bounds = array<i64: 256, 128>}]} {
    %c0_i32 = arith.constant 0 : i32
    %0 = arith.cmpi eq, %arg1, %c0_i32 : i32
    %1 = arith.extui %0 : i1 to i32
    %c0_i32_0 = arith.constant 0 : i32
    %2 = arith.cmpi ne, %1, %c0_i32_0 : i32
    scf.if %2 {
      %cst = arith.constant 0.000000e+00 : f32
      %11 = vector.broadcast %cst : f32 to vector<256x128xf32>
      %c0 = arith.constant 0 : index
      %c0_3 = arith.constant 0 : index
      %12 = vector.load %arg12[%c0, %c0_3] : memref<256x128xf32, #tpu.memory_space<vmem>>, vector<256x128xf32>
      tpu.vector_store %arg12[%c0, %c0_3], %11 {strides = array<i32>} : memref<256x128xf32, #tpu.memory_space<vmem>>, vector<256x128xf32>,
    } else {
    }
    %3 = arith.index_cast %arg0 : i32 to index
    %4 = memref.load %arg3[%3] : memref<2xi32, #tpu.memory_space<smem>>
    %5 = arith.cmpi slt, %arg1, %4 : i32
    %6 = arith.extui %5 : i1 to i32
    %c0_i32_1 = arith.constant 0 : i32
    %7 = arith.cmpi ne, %6, %c0_i32_1 : i32
    scf.if %7 {
      %c0 = arith.constant 0 : index
      %c0_3 = arith.constant 0 : index
      %11 = vector.load %arg6[%c0, %c0_3] : memref<512x128xbf16, #tpu.memory_space<vmem>>, vector<512x128xbf16>
      %12 = arith.extf %11 : vector<512x128xbf16> to vector<512x128xf32>
      %c0_4 = arith.constant 0 : index
      %c0_5 = arith.constant 0 : index
      %13 = vector.load %arg7[%c0_4, %c0_5] : memref<512x128xbf16, #tpu.memory_space<vmem>>, vector<512x128xbf16>
      %14 = arith.extf %13 : vector<512x128xbf16> to vector<512x128xf32>
      %15 = arith.addf %12, %14 : vector<512x128xf32>
      %cst = arith.constant 0.000000e+00 : f32
      %16 = vector.broadcast %cst : f32 to vector<512x128xf32>
      %17 = arith.maximumf %15, %16 : vector<512x128xf32>
      %c0_6 = arith.constant 0 : index
      %c0_7 = arith.constant 0 : index
      %18 = vector.load %arg5[%c0_6, %c0_7] : memref<512x1xf32, #tpu.memory_space<vmem>>, vector<512x1xf32>
      %19 = vector.broadcast %18 : vector<512x1xf32> to vector<512x128xf32>
      %20 = arith.mulf %17, %19 : vector<512x128xf32>
      %c0_8 = arith.constant 0 : index
      %c0_9 = arith.constant 0 : index
      %21 = vector.load %arg4[%c0_8, %c0_9] : memref<1x512xi32, #tpu.memory_space<vmem>>, vector<1x512xi32>
      %c256_i32 = arith.constant 256 : i32
      %22 = arith.muli %arg0, %c256_i32 : i32
      %23 = vector.broadcast %22 : i32 to vector<1x512xi32>
      %24 = arith.subi %21, %23 : vector<1x512xi32>
      %25 = tpu.iota {dimensions = array<i32: 0>} : vector<256x512xi32>
      %26 = vector.broadcast %24 : vector<1x512xi32> to vector<256x512xi32>
      %27 = arith.cmpi eq, %25, %26 : vector<256x512xi32>
      %28 = arith.extui %27 : vector<256x512xi1> to vector<256x512xi32>
      %29 = arith.sitofp %28 : vector<256x512xi32> to vector<256x512xf32>
      %30 = arith.truncf %29 : vector<256x512xf32> to vector<256x512xbf16>
      %c0_10 = arith.constant 0 : index
      %c0_11 = arith.constant 0 : index
      %31 = vector.load %arg12[%c0_10, %c0_11] : memref<256x128xf32, #tpu.memory_space<vmem>>, vector<256x128xf32>
      %32 = arith.truncf %20 : vector<512x128xf32> to vector<512x128xbf16>
      %cst_12 = arith.constant dense<0.000000e+00> : vector<256x128xf32>
      %33 = tpu.matmul %30, %32, %cst_12 {dimension_numbers = #tpu.dot_dimension_numbers<[1], [0], [0], [1], [0, 0, 1, 1], [], []>} : vector<256x512xbf16>, vector<512x128xbf16>, vector<256x128xf32> -> vector<256x128xf32>
      %34 = arith.addf %31, %33 : vector<256x128xf32>
      %c0_13 = arith.constant 0 : index
      %c0_14 = arith.constant 0 : index
      %35 = vector.load %arg12[%c0_13, %c0_14] : memref<256x128xf32, #tpu.memory_space<vmem>>, vector<256x128xf32>
      tpu.vector_store %arg12[%c0_13, %c0_14], %34 {strides = array<i32>} : memref<256x128xf32, #tpu.memory_space<vmem>>, vector<256x128xf32>,
    } else {
    }
    %c1_i32 = arith.constant 1 : i32
    %8 = arith.cmpi eq, %arg1, %c1_i32 : i32
    %9 = arith.extui %8 : i1 to i32
    %c0_i32_2 = arith.constant 0 : i32
    %10 = arith.cmpi ne, %9, %c0_i32_2 : i32
    scf.if %10 {
      %c0 = arith.constant 0 : index
      %c0_3 = arith.constant 0 : index
      %11 = vector.load %arg8[%c0, %c0_3] : memref<256x128xf32, #tpu.memory_space<vmem>>, vector<256x128xf32>
      %c0_4 = arith.constant 0 : index
      %c0_5 = arith.constant 0 : index
      %12 = vector.load %arg10[%c0_4, %c0_5] : memref<1x128xf32, #tpu.memory_space<vmem>>, vector<1x128xf32>
      %13 = vector.broadcast %12 : vector<1x128xf32> to vector<256x128xf32>
      %14 = arith.addf %11, %13 : vector<256x128xf32>
      %cst = arith.constant 0.000000e+00 : f32
      %15 = vector.broadcast %cst : f32 to vector<256x128xf32>
      %16 = arith.maximumf %14, %15 : vector<256x128xf32>
      %c0_6 = arith.constant 0 : index
      %c0_7 = arith.constant 0 : index
      %17 = vector.load %arg9[%c0_6, %c0_7] : memref<256x1xf32, #tpu.memory_space<vmem>>, vector<256x1xf32>
      %18 = vector.broadcast %17 : vector<256x1xf32> to vector<256x128xf32>
      %19 = arith.mulf %16, %18 : vector<256x128xf32>
      %c0_8 = arith.constant 0 : index
      %c0_9 = arith.constant 0 : index
      %20 = vector.load %arg12[%c0_8, %c0_9] : memref<256x128xf32, #tpu.memory_space<vmem>>, vector<256x128xf32>
      %21 = arith.addf %20, %19 : vector<256x128xf32>
      %c0_10 = arith.constant 0 : index
      %c0_11 = arith.constant 0 : index
      %22 = vector.load %arg11[%c0_10, %c0_11] : memref<256x128xf32, #tpu.memory_space<vmem>>, vector<256x128xf32>
      tpu.vector_store %arg11[%c0_10, %c0_11], %21 {strides = array<i32>} : memref<256x128xf32, #tpu.memory_space<vmem>>, vector<256x128xf32>,
    } else {
    }
    return
  }
  func.func @transform_0(%arg0: i32, %arg1: i32, %arg2: memref<2xi32, #tpu.memory_space<smem>>, %arg3: memref<2xi32, #tpu.memory_space<smem>>) -> (i32, i32) {
    %0 = arith.index_cast %arg0 : i32 to index
    %1 = memref.load %arg2[%0] : memref<2xi32, #tpu.memory_space<smem>>
    %2 = arith.index_cast %arg0 : i32 to index
    %3 = memref.load %arg3[%2] : memref<2xi32, #tpu.memory_space<smem>>
    %c1_i32 = arith.constant 1 : i32
    %4 = arith.subi %3, %c1_i32 : i32
    %c0_i32 = arith.constant 0 : i32
    %5 = arith.maxsi %4, %c0_i32 : i32
    %6 = arith.addi %1, %5 : i32
    %7 = arith.index_cast %arg0 : i32 to index
    %8 = memref.load %arg2[%7] : memref<2xi32, #tpu.memory_space<smem>>
    %9 = arith.addi %8, %arg1 : i32
    %10 = arith.minsi %9, %6 : i32
    %c0_i32_0 = arith.constant 0 : i32
    %c0_i32_1 = arith.constant 0 : i32
    return %c0_i32_0, %10 : i32, i32
  }
  func.func @transform_1(%arg0: i32, %arg1: i32, %arg2: memref<2xi32, #tpu.memory_space<smem>>, %arg3: memref<2xi32, #tpu.memory_space<smem>>) -> (i32, i32) {
    %0 = arith.index_cast %arg0 : i32 to index
    %1 = memref.load %arg2[%0] : memref<2xi32, #tpu.memory_space<smem>>
    %2 = arith.index_cast %arg0 : i32 to index
    %3 = memref.load %arg3[%2] : memref<2xi32, #tpu.memory_space<smem>>
    %c1_i32 = arith.constant 1 : i32
    %4 = arith.subi %3, %c1_i32 : i32
    %c0_i32 = arith.constant 0 : i32
    %5 = arith.maxsi %4, %c0_i32 : i32
    %6 = arith.addi %1, %5 : i32
    %7 = arith.index_cast %arg0 : i32 to index
    %8 = memref.load %arg2[%7] : memref<2xi32, #tpu.memory_space<smem>>
    %9 = arith.addi %8, %arg1 : i32
    %10 = arith.minsi %9, %6 : i32
    %c0_i32_0 = arith.constant 0 : i32
    %c0_i32_1 = arith.constant 0 : i32
    return %10, %c0_i32_0 : i32, i32
  }
  func.func @transform_2(%arg0: i32, %arg1: i32, %arg2: memref<2xi32, #tpu.memory_space<smem>>, %arg3: memref<2xi32, #tpu.memory_space<smem>>) -> (i32, i32) {
    %0 = arith.index_cast %arg0 : i32 to index
    %1 = memref.load %arg2[%0] : memref<2xi32, #tpu.memory_space<smem>>
    %2 = arith.index_cast %arg0 : i32 to index
    %3 = memref.load %arg3[%2] : memref<2xi32, #tpu.memory_space<smem>>
    %c1_i32 = arith.constant 1 : i32
    %4 = arith.subi %3, %c1_i32 : i32
    %c0_i32 = arith.constant 0 : i32
    %5 = arith.maxsi %4, %c0_i32 : i32
    %6 = arith.addi %1, %5 : i32
    %7 = arith.index_cast %arg0 : i32 to index
    %8 = memref.load %arg2[%7] : memref<2xi32, #tpu.memory_space<smem>>
    %9 = arith.addi %8, %arg1 : i32
    %10 = arith.minsi %9, %6 : i32
    %c0_i32_0 = arith.constant 0 : i32
    %c0_i32_1 = arith.constant 0 : i32
    return %10, %c0_i32_0 : i32, i32
  }
  func.func @transform_3(%arg0: i32, %arg1: i32, %arg2: memref<2xi32, #tpu.memory_space<smem>>, %arg3: memref<2xi32, #tpu.memory_space<smem>>) -> (i32, i32) {
    %0 = arith.index_cast %arg0 : i32 to index
    %1 = memref.load %arg2[%0] : memref<2xi32, #tpu.memory_space<smem>>
    %2 = arith.index_cast %arg0 : i32 to index
    %3 = memref.load %arg3[%2] : memref<2xi32, #tpu.memory_space<smem>>
    %c1_i32 = arith.constant 1 : i32
    %4 = arith.subi %3, %c1_i32 : i32
    %c0_i32 = arith.constant 0 : i32
    %5 = arith.maxsi %4, %c0_i32 : i32
    %6 = arith.addi %1, %5 : i32
    %7 = arith.index_cast %arg0 : i32 to index
    %8 = memref.load %arg2[%7] : memref<2xi32, #tpu.memory_space<smem>>
    %9 = arith.addi %8, %arg1 : i32
    %10 = arith.minsi %9, %6 : i32
    %c0_i32_0 = arith.constant 0 : i32
    %c0_i32_1 = arith.constant 0 : i32
    return %10, %c0_i32_0 : i32, i32
  }
  func.func @transform_4(%arg0: i32, %arg1: i32, %arg2: memref<2xi32, #tpu.memory_space<smem>>, %arg3: memref<2xi32, #tpu.memory_space<smem>>) -> (i32, i32) {
    %c0_i32 = arith.constant 0 : i32
    %c0_i32_0 = arith.constant 0 : i32
    return %arg0, %c0_i32 : i32, i32
  }
  func.func @transform_5(%arg0: i32, %arg1: i32, %arg2: memref<2xi32, #tpu.memory_space<smem>>, %arg3: memref<2xi32, #tpu.memory_space<smem>>) -> (i32, i32) {
    %c0_i32 = arith.constant 0 : i32
    %c0_i32_0 = arith.constant 0 : i32
    return %arg0, %c0_i32 : i32, i32
  }
  func.func @transform_6(%arg0: i32, %arg1: i32, %arg2: memref<2xi32, #tpu.memory_space<smem>>, %arg3: memref<2xi32, #tpu.memory_space<smem>>) -> (i32, i32) {
    %c0_i32 = arith.constant 0 : i32
    %c0_i32_0 = arith.constant 0 : i32
    %c0_i32_1 = arith.constant 0 : i32
    return %c0_i32, %c0_i32_0 : i32, i32
  }
  func.func @transform_7(%arg0: i32, %arg1: i32, %arg2: memref<2xi32, #tpu.memory_space<smem>>, %arg3: memref<2xi32, #tpu.memory_space<smem>>) -> (i32, i32) {
    %c0_i32 = arith.constant 0 : i32
    %c0_i32_0 = arith.constant 0 : i32
    return %arg0, %c0_i32 : i32, i32
  }
}

</mosaic_0001>

<bundles_post_ra>
// kernel: tpu_custom_call.1
= control target key start
LH: loop header
LB: loop body
LE: loop exit
PB: predicated region body
PF: predicated region fallthrough
CT: control target
= control target key end

     0   :  { %s4964_s0 = inlined_call_operand.vmem [shape: s32[2], index: 0, kind: input, shape index: {}]   ;;  %s4965_s2 = inlined_call_operand.vmem [shape: s32[1,1024], index: 2, kind: input, shape index: {}]   ;;  %s4966_s3 = inlined_call_operand.vmem [shape: f32[1024,1], index: 3, kind: input, shape index: {}]   ;;  %s4967_s4 = inlined_call_operand.vmem [shape: bf16[1024,128], index: 4, kind: input, shape index: {}]   ;;  %s4968_s5 = inlined_call_operand.vmem [shape: bf16[1024,128], index: 5, kind: input, shape index: {}]   ;;  %s4969_s6 = inlined_call_operand.vmem [shape: f32[512,128], index: 6, kind: input, shape index: {}]   ;;  %s4970_s7 = inlined_call_operand.vmem [shape: f32[512,1], index: 7, kind: input, shape index: {}]   ;;  %s4971_s8 = inlined_call_operand.hbm [shape: f32[1,128], index: 8, kind: input, shape index: {}]   ;;  %s4972_s9 = inlined_call_operand.hbm [shape: f32[512,128], index: 9, kind: output, shape index: {}]   ;;  %s4973_s1 = inlined_call_operand.hbm [shape: s32[2], index: 1, kind: input, shape index: {}]  }
   0x1   :  { %4980 = sst [smem:[#allocation20_spill]] %s4971_s8  ;;  %s14_s11 = sshll.u32 %s4964_s0, 4  ;;  %s15_s11 = int_to_ptr.vmem [resolvable:$true] %s14_s11 }
   0x2   :  { %s4016_s12 = scalar_lea.vmem %s15_s11, 16  ;;  %p4021_p1 = scmp.lt.s32.totalorder %s15_s11, %s15_s11 }
   0x3   :  { %p4017_p0 = scmp.ne.s32.totalorder %s15_s11, %s4016_s12  ;;  %p4022_p2 = scmp.lt.s32.totalorder %s4016_s12, %s4016_s12 }
   0x5   :  { %p4023_p3 = por %p4022_p2, %p4021_p1 }
   0x7   :  { %p4024_p4 = pnand %p4023_p3, %p4017_p0 }
   0x9   :  { %4027 = shalt.err (!%p4024_p4)  }
   0xa   :  { %s4162_s13 = smov [#allocation4]   ;;  %s4163_s14 = smov [#allocation5]  }
   0xb   :  { %17 = dma.vmem_to_smem %s15_s11, 16, %s4162_s13, [#allocation3] }
   0xc   :  { %19 = dma.hbm_to_smem %s4973_s1, 16, %s4163_s14, [#allocation3] }
   0xd   :  { %4120 = dma.done.wait [#allocation3], 32 }
   0xe   :  { %4121 = vsyncadd [#allocation3], 4294967264 }
   0xf   :  { %21 = sfence }
  0x10   :  { %22 = vsyncpa [#allocation7], 0 }
  0x11   :  { %23 = vsyncpa [#allocation8], 0 }
  0x12   :  { %25 = vsyncpa [#allocation8 + $0x1], 0  ;;  %s4228_s0 = smov 0   ;;  %s4230_s17 = smov 0  }
  0x13   :  { %s4232_s18 = smov 0   ;;  %s4234_s19 = smov 0  }
  0x14   :  { %s4236_s20 = smov 0   ;;  %s4238_s21 = smov 0  }
  0x15   :  { %s4240_s22 = smov 0   ;;  %s4242_s1 = smov 0  }
  0x16 LB: > { %4981 = sst [smem:[#allocation13_spill]] %s4140_s18  ;;  %s3082_s23 = sadd.s32 4294967295, %s4160_s1   ;;  %s4160_s1 = sphi %s4242_s1, %s31_s1   ;;  %s4156_s22 = sphi %s4240_s22, %s5004_s22   ;;  %s4152_s21 = sphi %s4238_s21, %s5003_s21   ;;  %s4148_s20 = sphi %s4236_s20, %s5002_s20   ;;  %s4144_s19 = sphi %s4234_s19, %s5001_s19   ;;  %s4140_s18 = sphi %s4232_s18, %s5000_s18   ;;  %s4136_s17 = sphi %s4230_s17, %s5006_s17   ;;  %s4132_s0 = sphi %s4228_s0, %s5005_s0  }
  0x17   : > { %4982 = sst [smem:[#allocation14_spill]] %s4152_s21  ;;  %s3083_s24 = sadd.s32 4294967294, %s4160_s1  }
  0x18   : > { %4983 = sst [smem:[#allocation15_spill]] %s4156_s22  ;;  %s40_s25 = sadd.s32 1, %s4152_s21 }
  0x19   : > { %s43_s26 = sadd.s32 1, %s4156_s22  ;;  %p41_p5 = scmp.ge.s32.totalorder %s40_s25, 2 }
  0x1a   : > { %s299_s27 = sadd.s32 1, %s4140_s18  ;;  %p309_p6 = scmp.ne.s32.totalorder %s4140_s18, %s4136_s17 }
  0x1b   : > { %p310_p7 = scmp.eq.s32.totalorder %s3082_s23, 3  ;;  %s5008_s25 = smov (%p41_p5, %s40_s25), 0 }
  0x1c   : > { %4984 = sst [smem:[#allocation16_spill]] %s5008_s25  ;;  %s5010_s26 = smov (!%p41_p5, %s43_s26), %s4156_s22 }
  0x1d   : > { %p4278_p8 = por %p310_p7, %p309_p6  ;;  %p315_p9 = scmp.ne.s32.totalorder %s4136_s17, %s4132_s0 }
  0x1e   : > { %p45_p10 = scmp.ge.s32.totalorder %s5010_s26, 2  ;;  %p316_p11 = scmp.eq.s32.totalorder %s3083_s24, 3 }
  0x1f   : > { %p3092_p12 = scmp.ge.s32.totalorder %s4160_s1, 1  ;;  %p323_p13 = scmp.lt.s32.totalorder %s4160_s1, 5 }
  0x20   : > { %s5012_s26 = smov (%p45_p10, %s5010_s26), 0  ;;  %p4288_p0 = por %p316_p11, %p315_p9 }
  0x21   : > { %4986 = sst [smem:[#allocation17_spill]] %s5012_s26  ;;  %p4292_p1 = pnand %p3092_p12, %p323_p13 }
  0x22   : > { %s4987_s29 = scalar_select %p4288_p0, 1, 0 }
  0x23   : > { %s296_s10 = ssub.s32 %s4156_s22, %s5012_s26  ;;  %p3928_p3 = pneg %p4292_p1 }
  0x24   : > { %4988 = sst [smem:[#allocation18_spill]] %s4987_s29  ;;  %p297_p2 = scmp.eq.s32.totalorder %s296_s10, 0 }
  0x25   : > { %p4300_p4 = scmp.eq.s32.totalorder %s3082_s23, 0  ;;  %s4164_s13 = smov [#allocation6]  }
  0x26   : > { %s4305_s12 = scalar_select %p297_p2, %s4140_s18, %s299_s27  }
  0x27   : > { %s336_s14 = sshll.u32 %s4164_s13, 4  ;;  %p3929_p5 = pnand %p4300_p4, %p3928_p3  ;;  %s337_s14 = int_to_ptr.vmem [resolvable:$true] %s336_s14 }
  0x28   : > { %4991 = sst [smem:[#allocation19_spill]] %s4305_s12  ;;  %s4047_s15 = scalar_lea.vmem %s337_s14, 16 }
  0x29   : > { %p4038_p6 = pneg %p3929_p5  ;;  %p4048_p7 = scmp.ne.s32.totalorder %s337_s14, %s4047_s15 }
  0x2a   : > { %s4054_s16 = scalar_lea.vmem %s337_s14, 32  ;;  %p4055_p11 = scmp.lt.s32.totalorder %s337_s14, %s337_s14 }
  0x2b   : > { %p4050_p9 = pnand %p4048_p7, %p4038_p6  ;;  %p4056_p12 = scmp.lt.s32.totalorder %s4054_s16, %s4047_s15 }
  0x2d   : > { %p4051_p10 = pneg %p4050_p9  ;;  %p4057_p13 = por %p4056_p12, %p4055_p11 }
  0x2f   : > { %p4058_p0 = pnand %p4057_p13, %p4051_p10 }
  0x31   : > { %4061 = shalt.err (!%p4058_p0)
}
  0x32   : > { %s4992_s8 = sld [smem:[#allocation20_spill]] }
  0x34   : > { %474 = sbr.rel (%p4292_p1) target bundleno = 935 (0x3a7), region = 48 }
  0x38   : > { %3931 = dma.hbm_to_vmem [thread:$0]  (!%p3929_p5), %s4992_s8, 16, %s337_s14, [#allocation7]  }
  0x39   : > { %4123 = dma.done.wait (%p4300_p4), [#allocation7], 16  }
  0x3a   : > { %4125 = vsyncadd (%p4300_p4), [#allocation7], 4294967280  ;;  %s4975_s27 = sand.u32 1, %s4136_s17   ;;  %s566_s10 = sld [smem:[#allocation4 + %s4148_s20]] }
  0x3b   : > { %s4321_s30 = sshll.u32 %s4975_s27, 8  ;;  %s567_s11 = sld [smem:[#allocation5 + %s4148_s20]] }
  0x3c   : > { %s590_s13 = sld [smem:[#allocation5 + %s4148_s20]] }
  0x3d   : > { %s589_s14 = sld [smem:[#allocation4 + %s4148_s20]] }
  0x3e   : > { %s4328_s15 = sld [smem:[#allocation5 + %s4148_s20]] }
  0x3f   : > { %s613_s24 = sld [smem:[#allocation4 + %s4148_s20]] }
  0x40   : > { %s572_s8 = sadd.s32 %s4144_s19, %s566_s10  ;;  %s4334_s25 = sld [smem:[#allocation4 + %s4148_s20]] }
  0x41   : > { %s3098_s23 = sadd.s32 4294967295, %s567_s11  ;;  %s638_s27 = sld [smem:[#allocation5 + %s4148_s20]] }
  0x42   : > { %p569_p0 = scmp.gt.s32.totalorder %s3098_s23, 0  ;;  %s3100_s26 = sadd.s32 4294967295, %s590_s13 }
  0x43   : > { %p592_p1 = scmp.gt.s32.totalorder %s3100_s26, 0  ;;  %s595_s21 = sadd.s32 %s4144_s19, %s589_s14 }
  0x44   : > { %s5014_s23 = smov (!%p569_p0, %s3098_s23), 0  ;;  %s3103_s12 = sadd.s32 4294967295, %s4328_s15 }
  0x45   : > { %s571_s22 = sadd.s32 %s5014_s23, %s566_s10  ;;  %s5016_s26 = smov (!%p592_p1, %s3100_s26), 0 }
  0x46   : > { %p573_p2 = scmp.lt.s32.totalorder %s572_s8, %s571_s22  ;;  %s594_s18 = sadd.s32 %s5016_s26, %s589_s14 }
  0x47   : > { %p616_p3 = scmp.gt.s32.totalorder %s3103_s12, 0  ;;  %p596_p4 = scmp.lt.s32.totalorder %s595_s21, %s594_s18 }
  0x48   : > { %s5018_s8 = smov (!%p573_p2, %s572_s8), %s571_s22  ;;  %s619_s11 = sadd.s32 %s4144_s19, %s613_s24 }
  0x49   : > { %s3099_s16 = sshll.u32 %s5018_s8, 2  ;;  %s5020_s21 = smov (!%p596_p4, %s595_s21), %s594_s18 }
  0x4a   : > { %p576_p5 = scmp.lt.s32.totalorder %s3099_s16, 7  ;;  %s3101_s13 = sshll.u32 %s5020_s21, 6 }
  0x4b   : > { %s3106_s10 = sadd.s32 4294967295, %s638_s27  ;;  %p599_p6 = scmp.lt.s32.totalorder %s3101_s13, 127 }
  0x4c   : > { %s5022_s16 = smov (!%p576_p5, %s3099_s16), 7  ;;  %s5024_s12 = smov (!%p616_p3, %s3103_s12), 0 }
  0x4d   : > { %s5026_s13 = smov (!%p599_p6, %s3101_s13), 127  ;;  %s618_s8 = sadd.s32 %s5024_s12, %s613_s24 }
  0x4e   : > { %p640_p7 = scmp.gt.s32.totalorder %s3106_s10, 0  ;;  %s3102_s22 = sshll.u32 %s5026_s13, 3 }
  0x4f   : > { %p620_p9 = scmp.lt.s32.totalorder %s619_s11, %s618_s8  ;;  %s4349_s14 = scalar_lea.vmem %s4966_s3, %s3102_s22 }
  0x50   : > { %s643_s21 = sadd.s32 %s4144_s19, %s4334_s25  ;;  %s5030_s10 = smov (!%p640_p7, %s3106_s10), 0 }
  0x51   : > { %s5028_s11 = smov (!%p620_p9, %s619_s11), %s618_s8  ;;  %s642_s29 = sadd.s32 %s5030_s10, %s4334_s25 }
  0x52   : > { %s3104_s27 = sshll.u32 %s5028_s11, 6  ;;  %p644_p11 = scmp.lt.s32.totalorder %s643_s21, %s642_s29 }
  0x53   : > { %p623_p10 = scmp.lt.s32.totalorder %s3104_s27, 127  ;;  %s4993_s23 = sshll.u32 %s4148_s20, 5 }
  0x54   : > { %p662_p12 = scmp.lt.s32.totalorder %s4993_s23, 63  ;;  %s5034_s21 = smov (!%p644_p11, %s643_s21), %s642_s29 }
  0x55   : > { %s5032_s27 = smov (!%p623_p10, %s3104_s27), 127  ;;  %s3107_s22 = sshll.u32 %s5034_s21, 6 }
  0x56   : > { %s3105_s12 = sshll.u32 %s5032_s27, 2  ;;  %p647_p13 = scmp.lt.s32.totalorder %s3107_s22, 127 }
  0x57   : > { %s4359_s26 = scalar_lea.vmem %s4967_s4, %s3105_s12  ;;  %s4994_s18 = smov %s4993_s23 }
  0x58   : > { %s5036_s18 = smov (!%p662_p12, %s4994_s18), 63  ;;  %s5038_s22 = smov (!%p647_p13, %s3107_s22), 127 }
  0x59   : > { %s3110_s11 = sshll.u32 %s5036_s18, 3  ;;  %s3108_s8 = sshll.u32 %s5038_s22, 2 }
  0x5a   : > { %s4366_s15 = scalar_lea.vmem %s4969_s6, %s3110_s11  ;;  %s4371_s27 = scalar_lea.vmem %s4968_s5, %s3108_s8 }
  0x5b   : > { %s4376_s21 = scalar_lea.vmem %s4970_s7, %s3110_s11  ;;  %s4379_s13 = scalar_lea.vmem [#allocation9], %s4321_s30 }
  0x5c   : > { %p3113_p0 = scmp.ne.s32.totalorder %s4144_s19, 0 }
  0x5e   : > { %678 = sbr.rel (%p3113_p0) target bundleno = 116 (0x74), region = 56 }
  0x63   : > { %v4165_v0 = vmov 0.0  }
  0x64   : > { %679 = vst [vmem:[#allocation2 + $0xb0] sm:$0xff] %v4165_v0  ;;  %680 = vst [vmem:[#allocation2] sm:$0xff] %v4165_v0 }
  0x65   : > { %681 = vst [vmem:[#allocation2 + $0xd8] sm:$0xff] %v4165_v0  ;;  %682 = vst [vmem:[#allocation2 + $0x18] sm:$0xff] %v4165_v0 }
  0x66   : > { %683 = vst [vmem:[#allocation2 + $0x50] sm:$0xff] %v4165_v0  ;;  %684 = vst [vmem:[#allocation2 + $0x68] sm:$0xff] %v4165_v0 }
  0x67   : > { %685 = vst [vmem:[#allocation2 + $0x30] sm:$0xff] %v4165_v0  ;;  %686 = vst [vmem:[#allocation2 + $0x48] sm:$0xff] %v4165_v0 }
  0x68   : > { %687 = vst [vmem:[#allocation2 + $0x80] sm:$0xff] %v4165_v0  ;;  %688 = vst [vmem:[#allocation2 + $0x88] sm:$0xff] %v4165_v0 }
  0x69   : > { %689 = vst [vmem:[#allocation2 + $0xe8] sm:$0xff] %v4165_v0  ;;  %690 = vst [vmem:[#allocation2 + $0xb8] sm:$0xff] %v4165_v0 }
  0x6a   : > { %691 = vst [vmem:[#allocation2 + $0x60] sm:$0xff] %v4165_v0  ;;  %692 = vst [vmem:[#allocation2 + $0xf0] sm:$0xff] %v4165_v0 }
  0x6b   : > { %693 = vst [vmem:[#allocation2 + $0x8] sm:$0xff] %v4165_v0  ;;  %694 = vst [vmem:[#allocation2 + $0x78] sm:$0xff] %v4165_v0 }
  0x6c   : > { %695 = vst [vmem:[#allocation2 + $0x38] sm:$0xff] %v4165_v0  ;;  %696 = vst [vmem:[#allocation2 + $0x58] sm:$0xff] %v4165_v0 }
  0x6d   : > { %697 = vst [vmem:[#allocation2 + $0x40] sm:$0xff] %v4165_v0  ;;  %698 = vst [vmem:[#allocation2 + $0xc8] sm:$0xff] %v4165_v0 }
  0x6e   : > { %699 = vst [vmem:[#allocation2 + $0xe0] sm:$0xff] %v4165_v0  ;;  %700 = vst [vmem:[#allocation2 + $0x90] sm:$0xff] %v4165_v0 }
  0x6f   : > { %701 = vst [vmem:[#allocation2 + $0x70] sm:$0xff] %v4165_v0  ;;  %702 = vst [vmem:[#allocation2 + $0xc0] sm:$0xff] %v4165_v0 }
  0x70   : > { %703 = vst [vmem:[#allocation2 + $0xa8] sm:$0xff] %v4165_v0  ;;  %704 = vst [vmem:[#allocation2 + $0xd0] sm:$0xff] %v4165_v0 }
  0x71   : > { %705 = vst [vmem:[#allocation2 + $0x10] sm:$0xff] %v4165_v0  ;;  %706 = vst [vmem:[#allocation2 + $0x28] sm:$0xff] %v4165_v0 }
  0x72   : > { %707 = vst [vmem:[#allocation2 + $0xa0] sm:$0xff] %v4165_v0  ;;  %708 = vst [vmem:[#allocation2 + $0xf8] sm:$0xff] %v4165_v0 }
  0x73   : > { %709 = vst [vmem:[#allocation2 + $0x20] sm:$0xff] %v4165_v0  ;;  %710 = vst [vmem:[#allocation2 + $0x98] sm:$0xff] %v4165_v0 }
  0x74 PF: > { %s711_s30 = sld [smem:[#allocation5 + %s4148_s20]] }
  0x7a   : > { %p3114_p1 = scmp.ge.s32.totalorder %s4144_s19, %s711_s30 }
  0x7b   : > { %s3115_s22 = sshll.u32 (!%p3114_p1), %s4148_s20, 8  ;;  %s4995_s8 = scalar_lea.vmem (!%p3114_p1), %s4965_s2, %s5022_s16 }
  0x7c   : > { %715 = sbr.rel (%p3114_p1) target bundleno = 712 (0x2c8), region = 60 }
  0x81   : > { %v1162_v1 = vld [vmem:[%s4349_s14 + $0x1f0] sm:$0xff]  ;;  %v4166_v3 = vmov 0   ;;  %v1163_v4 = vld [vmem:[%s4349_s14 + $0x1f8] sm:$0xff]  ;;  %v1129_v10 = vld [vmem:[%s4349_s14 + $0xe8] sm:$0xff]  ;;  %v1552_v0 = vlaneseq }
  0x82   : > { %v1130_v2 = vld [vmem:[%s4349_s14 + $0xf0] sm:$0xff]  ;;  %4013 = vset.pattern.permute.xlu1 %v4166_v3  ;;  %4012 = vset.pattern.permute.xlu0 %v4166_v3  ;;  %v1131_v5 = vld [vmem:[%s4349_s14 + $0xf8] sm:$0xff]  ;;  %v1128_v11 = vld [vmem:[%s4349_s14 + $0xe0] sm:$0xff] }
  0x83   : > { %1476 = vperm.xlu1 %4013, %v1162_v1   ;;  %1316 = vperm.xlu0 %4012, %v1130_v2   ;;  %v1115_v6 = vld [vmem:[%s4349_s14 + $0x78] sm:$0xff]  ;;  %v1114_v7 = vld [vmem:[%s4349_s14 + $0x70] sm:$0xff]  ;;  %v1161_v12 = vld [vmem:[%s4349_s14 + $0x1e8] sm:$0xff] }
  0x84   : > { %v1147_v8 = vld [vmem:[%s4349_s14 + $0x178] sm:$0xff]  ;;  %v1146_v9 = vld [vmem:[%s4349_s14 + $0x170] sm:$0xff]  ;;  %v1160_v13 = vld [vmem:[%s4349_s14 + $0x1e0] sm:$0xff] }
  0x85   : > { %v1113_v14 = vld [vmem:[%s4349_s14 + $0x68] sm:$0xff]  ;;  %v1112_v15 = vld [vmem:[%s4349_s14 + $0x60] sm:$0xff]  ;;  %v1127_v18 = vld [vmem:[%s4349_s14 + $0xd8] sm:$0xff] }
  0x86   : > { %v1145_v16 = vld [vmem:[%s4349_s14 + $0x168] sm:$0xff]  ;;  %v1144_v17 = vld [vmem:[%s4349_s14 + $0x160] sm:$0xff]  ;;  %v1126_v19 = vld [vmem:[%s4349_s14 + $0xd0] sm:$0xff] }
  0x87   : > { %1481 = vperm.xlu1 %4013, %v1163_v4   ;;  %1321 = vperm.xlu0 %4012, %v1131_v5   ;;  %v1159_v20 = vld [vmem:[%s4349_s14 + $0x1d8] sm:$0xff]  ;;  %v1158_v21 = vld [vmem:[%s4349_s14 + $0x1d0] sm:$0xff]  ;;  %v1125_v26 = vld [vmem:[%s4349_s14 + $0xc8] sm:$0xff] }
  0x88   : > { %v1111_v22 = vld [vmem:[%s4349_s14 + $0x58] sm:$0xff]  ;;  %v1110_v23 = vld [vmem:[%s4349_s14 + $0x50] sm:$0xff]  ;;  %v1124_v27 = vld [vmem:[%s4349_s14 + $0xc0] sm:$0xff] }
  0x89   : > { %v1143_v24 = vld [vmem:[%s4349_s14 + $0x158] sm:$0xff]  ;;  %v1142_v25 = vld [vmem:[%s4349_s14 + $0x150] sm:$0xff]  ;;  %v1157_v28 = vld [vmem:[%s4349_s14 + $0x1c8] sm:$0xff] }
  0x8a   : > { %v1156_v29 = vld [vmem:[%s4349_s14 + $0x1c0] sm:$0xff]  ;;  %v1109_v30 = vld [vmem:[%s4349_s14 + $0x48] sm:$0xff]  ;;  %v1123_v34 = vld [vmem:[%s4349_s14 + $0xb8] sm:$0xff] }
  0x8b   : > { %1241 = vperm.xlu1 %4013, %v1115_v6   ;;  %1236 = vperm.xlu0 %4012, %v1114_v7   ;;  %v1108_v31 = vld [vmem:[%s4349_s14 + $0x40] sm:$0xff]  ;;  %v1141_v32 = vld [vmem:[%s4349_s14 + $0x148] sm:$0xff]  ;;  %v1122_v35 = vld [vmem:[%s4349_s14 + $0xb0] sm:$0xff] }
  0x8c   : > { %v1140_v33 = vld [vmem:[%s4349_s14 + $0x140] sm:$0xff]  ;;  %v1155_v36 = vld [vmem:[%s4349_s14 + $0x1b8] sm:$0xff]  ;;  %v1154_v37 = vld [vmem:[%s4349_s14 + $0x1b0] sm:$0xff] }
  0x8d   : > { %v1107_v38 = vld [vmem:[%s4349_s14 + $0x38] sm:$0xff]  ;;  %v1106_v39 = vld [vmem:[%s4349_s14 + $0x30] sm:$0xff]  ;;  %v1121_v42 = vld [vmem:[%s4349_s14 + $0xa8] sm:$0xff] }
  0x8e   : > { %v1139_v40 = vld [vmem:[%s4349_s14 + $0x138] sm:$0xff]  ;;  %v1138_v41 = vld [vmem:[%s4349_s14 + $0x130] sm:$0xff]  ;;  %v1120_v43 = vld [vmem:[%s4349_s14 + $0xa0] sm:$0xff] }
  0x8f   : > { %1401 = vperm.xlu1 %4013, %v1147_v8   ;;  %1396 = vperm.xlu0 %4012, %v1146_v9   ;;  %v1153_v44 = vld [vmem:[%s4349_s14 + $0x1a8] sm:$0xff]  ;;  %v1152_v45 = vld [vmem:[%s4349_s14 + $0x1a0] sm:$0xff]  ;;  %v1119_v50 = vld [vmem:[%s4349_s14 + $0x98] sm:$0xff] }
  0x90   : > { %v1105_v46 = vld [vmem:[%s4349_s14 + $0x28] sm:$0xff]  ;;  %v1104_v47 = vld [vmem:[%s4349_s14 + $0x20] sm:$0xff]  ;;  %v1118_v51 = vld [vmem:[%s4349_s14 + $0x90] sm:$0xff] }
  0x91   : > { %v1137_v48 = vld [vmem:[%s4349_s14 + $0x128] sm:$0xff]  ;;  %v1136_v49 = vld [vmem:[%s4349_s14 + $0x120] sm:$0xff]  ;;  %v1151_v52 = vld [vmem:[%s4349_s14 + $0x198] sm:$0xff] }
  0x92   : > { %v1150_v53 = vld [vmem:[%s4349_s14 + $0x190] sm:$0xff]  ;;  %v1103_v54 = vld [vmem:[%s4349_s14 + $0x18] sm:$0xff]  ;;  %v1117_v58 = vld [vmem:[%s4349_s14 + $0x88] sm:$0xff] }
  0x93   : > { %1311 = vperm.xlu1 %4013, %v1129_v10   ;;  %1306 = vperm.xlu0 %4012, %v1128_v11   ;;  %v1102_v55 = vld [vmem:[%s4349_s14 + $0x10] sm:$0xff]  ;;  %v1135_v56 = vld [vmem:[%s4349_s14 + $0x118] sm:$0xff]  ;;  %v1116_v59 = vld [vmem:[%s4349_s14 + $0x80] sm:$0xff]  ;;  %v1550_v11 = vstv %s3115_s22 }
  0x94   : > { %v1134_v57 = vld [vmem:[%s4349_s14 + $0x110] sm:$0xff]  ;;  %v3666_v60 = vld [vmem:[%s4359_s26 + $0xf8] sm:$0xff]   ;;  %v1149_v1 = vld [vmem:[%s4349_s14 + $0x188] sm:$0xff] }
  0x95   : > { %v3697_v61 = vld [vmem:[%s4371_s27 + $0xf8] sm:$0xff]   ;;  %v1148_v2 = vld [vmem:[%s4349_s14 + $0x180] sm:$0xff]  ;;  %v3506_v3 = vunpack.c.l.bf16 %v3666_v60  ;;  %v3507_v5 = vunpack.c.h.bf16 %v3666_v60 }
  0x96   : > { %v3650_v62 = vld [vmem:[%s4359_s26 + $0x78] sm:$0xff]   ;;  %v3634_v4 = vunpack.c.l.bf16 %v3697_v61  ;;  %v1548_v10 = vld [vmem:[%s4995_s8] sm:$0xf] }
  0x97   : > { %1471 = vperm.xlu1 %4013, %v1161_v12   ;;  %1466 = vperm.xlu0 %4012, %v1160_v13   ;;  %v3681_v63 = vld [vmem:[%s4371_s27 + $0x78] sm:$0xff]   ;;  %v3442_v6 = vunpack.c.l.bf16 %v3650_v62  ;;  %v4456_v12 = vshrl.u32 %v1552_v0, 7  ;;  %v3635_v13 = vunpack.c.h.bf16 %v3697_v61  ;;  %v3665_v61 = vld [vmem:[%s4359_s26 + $0xf0] sm:$0xff]  }
  0x98   : > { %v3570_v7 = vunpack.c.l.bf16 %v3681_v63  ;;  %v3642_v8 = vld [vmem:[%s4359_s26 + $0x38] sm:$0xff]  }
  0x99   : > { %v3673_v9 = vld [vmem:[%s4371_s27 + $0x38] sm:$0xff]  }
  0x9b   : > { %1231 = vperm.xlu1 %4013, %v1113_v14   ;;  %1226 = vperm.xlu0 %4012, %v1112_v15   ;;  %v3443_v14 = vunpack.c.h.bf16 %v3650_v62  ;;  %v3571_v15 = vunpack.c.h.bf16 %v3681_v63  ;;  %v3696_v62 = vld [vmem:[%s4371_s27 + $0xf0] sm:$0xff]  }
  0x9f   : > { %1391 = vperm.xlu1 %4013, %v1145_v16   ;;  %1386 = vperm.xlu0 %4012, %v1144_v17   ;;  %v4458_v16 = vsub.s32 %v1548_v10, %v1550_v11  ;;  %v1101_v17 = vld [vmem:[%s4349_s14 + $0x8] sm:$0xff]  ;;  %v3502_v11 = vunpack.c.l.bf16 %v3665_v61 }
  0xa3   : > { %1301 = vperm.xlu1 %4013, %v1127_v18   ;;  %1296 = vperm.xlu0 %4012, %v1126_v19   ;;  %v1100_v18 = vld [vmem:[%s4349_s14] sm:$0xff]  ;;  %v1591_v19 = vsub.s32 1, %v4456_v12 }
  0xa7   : > { %1461 = vperm.xlu1 %4013, %v1159_v20   ;;  %1456 = vperm.xlu0 %4012, %v1158_v21   ;;  %v3411_v20 = vunpack.c.h.bf16 %v3642_v8  ;;  %v3539_v21 = vunpack.c.h.bf16 %v3673_v9 }
  0xab   : > { %1221 = vperm.xlu1 %4013, %v1111_v22   ;;  %1216 = vperm.xlu0 %4012, %v1110_v23   ;;  %v4464_v22 = vadd.s32 8, %v4456_v12  ;;  %v1034_v23 = vadd.f32 %v3634_v4, %v3506_v3 }
  0xaf   : > { %1381 = vperm.xlu1 %4013, %v1143_v24   ;;  %1376 = vperm.xlu0 %4012, %v1142_v25   ;;  %v3410_v24 = vunpack.c.l.bf16 %v3642_v8  ;;  %v3538_v25 = vunpack.c.l.bf16 %v3673_v9 }
  0xb3   : > { %1291 = vperm.xlu1 %4013, %v1125_v26   ;;  %1286 = vperm.xlu0 %4012, %v1124_v27   ;;  %v3658_v26 = vld [vmem:[%s4359_s26 + $0xb8] sm:$0xff]  }
  0xb4   : > { %v3689_v27 = vld [vmem:[%s4371_s27 + $0xb8] sm:$0xff]  }
  0xb7   : > { %1451 = vperm.xlu1 %4013, %v1157_v28   ;;  %1446 = vperm.xlu0 %4012, %v1156_v29   ;;  %v4469_v28 = vrot.slane %v4458_v16, %v1591_v19  ;;  %v1002_v29 = vadd.f32 %v3570_v7, %v3442_v6  ;;  %v3631_v6 = vunpack.c.h.bf16 %v3696_v62 }
  0xb9   : > { %vm1602_vm0 = vcmp.eq.s32.totalorder %v4456_v12, %v4469_v28  ;;  %vm1606_vm1 = vcmp.eq.s32.totalorder %v4464_v22, %v4469_v28 }
  0xba   : > { %vm3244_vm2 = vmpackc.low %vm1606_vm1, %vm1602_vm0 }
  0xbb   : > { %1211 = vperm.xlu1 %4013, %v1109_v30   ;;  %1206 = vperm.xlu0 %4012, %v1108_v31   ;;  %v1035_v30 = vadd.f32 %v3635_v13, %v3507_v5  ;;  %v1003_v31 = vadd.f32 %v3571_v15, %v3443_v14  ;;  %v3503_v5 = vunpack.c.h.bf16 %v3665_v61  ;;  %v3630_v13 = vunpack.c.l.bf16 %v3696_v62  ;;  %v3641_v14 = vld [vmem:[%s4359_s26 + $0x30] sm:$0xff]  }
  0xbc   : > { %v3672_v15 = vld [vmem:[%s4371_s27 + $0x30] sm:$0xff]  }
  0xbf   : > { %1371 = vperm.xlu1 %4013, %v1141_v32   ;;  %1366 = vperm.xlu0 %4012, %v1140_v33   ;;  %v1599_v32 = vsub.s32 3, %v4456_v12  ;;  %v1133_v33 = vld [vmem:[%s4349_s14 + $0x108] sm:$0xff] }
  0xc3   : > { %1281 = vperm.xlu1 %4013, %v1123_v34   ;;  %1276 = vperm.xlu0 %4012, %v1122_v35   ;;  %v1132_v34 = vld [vmem:[%s4349_s14 + $0x100] sm:$0xff]  ;;  %v987_v35 = vadd.f32 %v3539_v21, %v3411_v20 }
  0xc7   : > { %1441 = vperm.xlu1 %4013, %v1155_v36   ;;  %1436 = vperm.xlu0 %4012, %v1154_v37   ;;  %v3475_v36 = vunpack.c.h.bf16 %v3658_v26  ;;  %v3603_v37 = vunpack.c.h.bf16 %v3689_v27 }
  0xcb   : > { %1201 = vperm.xlu1 %4013, %v1107_v38   ;;  %1196 = vperm.xlu0 %4012, %v1106_v39   ;;  %v4479_v38 = vrot.slane %v4458_v16, %v1599_v32 }
  0xcd   : > { %vm1604_vm3 = vcmp.eq.s32.totalorder %v4456_v12, %v4479_v38  ;;  %vm1608_vm4 = vcmp.eq.s32.totalorder %v4464_v22, %v4479_v38 }
  0xce   : > { %vm3308_vm5 = vmpackc.low %vm1608_vm4, %vm1604_vm3 }
  0xcf   : > { %1361 = vperm.xlu1 %4013, %v1139_v40   ;;  %1356 = vperm.xlu0 %4012, %v1138_v41   ;;  %v1098_v40 = vmax.f32 %v1034_v23, 0.0  ;;  %v1033_v23 = vadd.f32 %v3631_v6, %v3503_v5 }
  0xd3   : > { %1271 = vperm.xlu1 %4013, %v1121_v42   ;;  %1266 = vperm.xlu0 %4012, %v1120_v43   ;;  %v986_v42 = vadd.f32 %v3538_v25, %v3410_v24  ;;  %v3474_v43 = vunpack.c.l.bf16 %v3658_v26  ;;  %v3407_v24 = vunpack.c.h.bf16 %v3641_v14  ;;  %v3535_v25 = vunpack.c.h.bf16 %v3672_v15 }
  0xd7   : > { %1431 = vperm.xlu1 %4013, %v1153_v44   ;;  %1426 = vperm.xlu0 %4012, %v1152_v45   ;;  %v3602_v44 = vunpack.c.l.bf16 %v3689_v27  ;;  %v3649_v45 = vld [vmem:[%s4359_s26 + $0x70] sm:$0xff]  }
  0xdb   : > { %1191 = vperm.xlu1 %4013, %v1105_v46   ;;  %1186 = vperm.xlu0 %4012, %v1104_v47   ;;  %v3680_v46 = vld [vmem:[%s4371_s27 + $0x70] sm:$0xff]   ;;  %v4167_v47 = vmov 1.0|1.0  }
  0xdc   : > { %3245 = vmatprep.mubr.msk.bf16.mxu0 %vm3244_vm2, %v4167_v47  ;;  %v3566_v60 = vunpack.c.l.bf16 %v3680_v46  ;;  %3309 = vmatprep.mubr.msk.bf16.mxu1 %vm3308_vm5, %v4167_v47 }
  0xdf   : > { %1351 = vperm.xlu1 %4013, %v1137_v48   ;;  %1346 = vperm.xlu0 %4012, %v1136_v49   ;;  %v1066_v48 = vmax.f32 %v1002_v29, 0.0  ;;  %v1099_v49 = vmax.f32 %v1035_v30, 0.0  ;;  %v1032_v29 = vadd.f32 %v3630_v13, %v3502_v11  ;;  %v3406_v30 = vunpack.c.l.bf16 %v3641_v14 }
  0xe3   : > { %1261 = vperm.xlu1 %4013, %v1119_v50   ;;  %1256 = vperm.xlu0 %4012, %v1118_v51   ;;  %v1067_v50 = vmax.f32 %v1003_v31, 0.0  ;;  %v1051_v51 = vmax.f32 %v987_v35, 0.0  ;;  %v3534_v31 = vunpack.c.l.bf16 %v3672_v15 }
  0xe7   : > { %1421 = vperm.xlu1 %4013, %v1151_v52   ;;  %1416 = vperm.xlu0 %4012, %v1150_v53   ;;  %v1019_v52 = vadd.f32 %v3603_v37, %v3475_v36  ;;  %v3439_v53 = vunpack.c.h.bf16 %v3649_v45  ;;  %v3657_v36 = vld [vmem:[%s4359_s26 + $0xb0] sm:$0xff]  }
  0xe8   : > { %v3688_v37 = vld [vmem:[%s4371_s27 + $0xb0] sm:$0xff]  }
  0xe9   : > { %v1083_v9 = vmax.f32 %v1019_v52, 0.0 }
  0xeb   : > { %1181 = vperm.xlu1 %4013, %v1103_v54   ;;  %1176 = vperm.xlu0 %4012, %v1102_v55   ;;  %v3567_v54 = vunpack.c.h.bf16 %v3680_v46  ;;  %v3471_v46 = vunpack.c.h.bf16 %v3657_v36 }
  0xed   : > { %v1001_v10 = vadd.f32 %v3567_v54, %v3439_v53  ;;  %v3470_v53 = vunpack.c.l.bf16 %v3657_v36  ;;  %v3598_v54 = vunpack.c.l.bf16 %v3688_v37 }
  0xef   : > { %1341 = vperm.xlu1 %4013, %v1135_v56   ;;  %1336 = vperm.xlu0 %4012, %v1134_v57   ;;  %v1050_v57 = vmax.f32 %v986_v42, 0.0  ;;  %v1016_v5 = vadd.f32 %v3598_v54, %v3470_v53 }
  0xf3   : > { %1251 = vperm.xlu1 %4013, %v1117_v58   ;;  %1246 = vperm.xlu0 %4012, %v1116_v59   ;;  %v1018_v58 = vadd.f32 %v3602_v44, %v3474_v43  ;;  %v3438_v59 = vunpack.c.l.bf16 %v3649_v45  ;;  %v1096_v44 = vmax.f32 %v1032_v29, 0.0  ;;  %v984_v45 = vadd.f32 %v3534_v31, %v3406_v30 }
  0xf5   : > { %v1082_v19 = vmax.f32 %v1018_v58, 0.0  ;;  %v1000_v20 = vadd.f32 %v3566_v60, %v3438_v59 }
  0xf7   : > { %1411 = vperm.xlu1 %4013, %v1149_v1   ;;  %1406 = vperm.xlu0 %4012, %v1148_v2   ;;  %v1064_v35 = vmax.f32 %v1000_v20, 0.0  ;;  %v1080_v20 = vmax.f32 %v1016_v5, 0.0 }
  0xfb   : > { %1171 = vperm.xlu1 %4013, %v1101_v17   ;;  %1166 = vperm.xlu0 %4012, %v1100_v18  }
  0xfe   : > { %v1477_v39 = vpop.permute.xlu1 %1476  ;;  %v1317_v41 = vpop.permute.xlu0 %1316 }
  0xff   : > { %1331 = vperm.xlu1 %4013, %v1133_v33   ;;  %1326 = vperm.xlu0 %4012, %v1132_v34   ;;  %v1546_v63 = vmul.f32 %v1477_v39, %v1098_v40  ;;  %v1514_v0 = vmul.f32 %v1317_v41, %v1066_v48  ;;  %v1065_v34 = vmax.f32 %v1001_v10, 0.0  ;;  %v1097_v40 = vmax.f32 %v1033_v23, 0.0  ;;  %v3671_v23 = vld [vmem:[%s4371_s27 + $0x28] sm:$0xff]  }
 0x100   : > { %v985_v41 = vadd.f32 %v3535_v25, %v3407_v24  ;;  %v3599_v48 = vunpack.c.h.bf16 %v3688_v37 }
 0x102   : > { %v1482_v55 = vpop.permute.xlu1 %1481  ;;  %v1322_v56 = vpop.permute.xlu0 %1321  ;;  %v1049_v60 = vmax.f32 %v985_v41, 0.0  ;;  %v1017_v61 = vadd.f32 %v3599_v48, %v3471_v46 }
 0x103   : > { %v1547_v1 = vmul.f32 %v1482_v55, %v1099_v49  ;;  %v1515_v2 = vmul.f32 %v1322_v56, %v1067_v50  ;;  %v3648_v49 = vld [vmem:[%s4359_s26 + $0x68] sm:$0xff]  }
 0x104   : > { %v3679_v50 = vld [vmem:[%s4371_s27 + $0x68] sm:$0xff]   ;;  %v3435_v56 = vunpack.c.h.bf16 %v3648_v49  ;;  %v3434_v62 = vunpack.c.l.bf16 %v3648_v49 }
 0x105   : > { %v2096_v3 = vpack.c.bf16 %v1515_v2, %v1514_v0  ;;  %v2112_v4 = vpack.c.bf16 %v1547_v1, %v1546_v63  ;;  %v3562_v63 = vunpack.c.l.bf16 %v3679_v50  ;;  %v3664_v0 = vld [vmem:[%s4359_s26 + $0xe8] sm:$0xff]  }
 0x106   : > { %v1242_v7 = vpop.permute.xlu1 %1241  ;;  %v1237_v8 = vpop.permute.xlu0 %1236  ;;  %v3695_v1 = vld [vmem:[%s4371_s27 + $0xe8] sm:$0xff]   ;;  %v3498_v14 = vunpack.c.l.bf16 %v3664_v0 }
 0x107   : > { %v1499_v17 = vmul.f32 %v1242_v7, %v1051_v51  ;;  %v1498_v18 = vmul.f32 %v1237_v8, %v1050_v57  ;;  %3698 = vmatprep.subr.bf16.mxu0 %v2096_v3  ;;  %3810 = vmatprep.subr.bf16.mxu1 %v2112_v4  ;;  %v3563_v57 = vunpack.c.h.bf16 %v3679_v50  ;;  %v1048_v4 = vmax.f32 %v984_v45, 0.0 }
 0x108   : > { %v3499_v8 = vunpack.c.h.bf16 %v3664_v0  ;;  %v998_v13 = vadd.f32 %v3562_v63, %v3434_v62  ;;  %v3626_v15 = vunpack.c.l.bf16 %v3695_v1 }
 0x109   : > { %v2088_v21 = vpack.c.bf16 %v1499_v17, %v1498_v18  ;;  %v999_v7 = vadd.f32 %v3563_v57, %v3435_v56 }
 0x10a   : > { %v1402_v26 = vpop.permute.xlu1 %1401  ;;  %v1397_v27 = vpop.permute.xlu0 %1396  ;;  %v1062_v30 = vmax.f32 %v998_v13, 0.0  ;;  %v1030_v31 = vadd.f32 %v3626_v15, %v3498_v14 }
 0x10b   : > { %v1531_v32 = vmul.f32 %v1402_v26, %v1083_v9  ;;  %v1530_v33 = vmul.f32 %v1397_v27, %v1082_v19  ;;  %3699 = vmatpush3.bf16.msra.mxu0 %v2088_v21  ;;  %v3627_v9 = vunpack.c.h.bf16 %v3695_v1  ;;  %v1081_v19 = vmax.f32 %v1017_v61, 0.0  ;;  %v3640_v21 = vld [vmem:[%s4359_s26 + $0x28] sm:$0xff]  }
 0x10c   : > { %v1063_v25 = vmax.f32 %v999_v7, 0.0  ;;  %v3694_v7 = vld [vmem:[%s4371_s27 + $0xe0] sm:$0xff]  }
 0x10d   : > { %v2104_v39 = vpack.c.bf16 %v1531_v32, %v1530_v33  ;;  %v1031_v26 = vadd.f32 %v3627_v9, %v3499_v8  ;;  %v3403_v32 = vunpack.c.h.bf16 %v3640_v21  ;;  %v3531_v33 = vunpack.c.h.bf16 %v3671_v23 }
 0x10e   : > { %v1312_v42 = vpop.permute.xlu1 %1311  ;;  %v1307_v43 = vpop.permute.xlu0 %1306 }
 0x10f   : > { %v1513_v51 = vmul.f32 %v1312_v42, %v1065_v34  ;;  %v1512_v52 = vmul.f32 %v1307_v43, %v1064_v35  ;;  %3811 = vmatpush3.bf16.msra.mxu1 %v2104_v39  ;;  %v3656_v34 = vld [vmem:[%s4359_s26 + $0xa8] sm:$0xff]   ;;  %v3402_v39 = vunpack.c.l.bf16 %v3640_v21  ;;  %v1095_v46 = vmax.f32 %v1031_v26, 0.0 }
 0x110   : > { %v3687_v35 = vld [vmem:[%s4371_s27 + $0xa8] sm:$0xff]   ;;  %v3467_v42 = vunpack.c.h.bf16 %v3656_v34  ;;  %v983_v48 = vadd.f32 %v3531_v33, %v3403_v32  ;;  %v3466_v49 = vunpack.c.l.bf16 %v3656_v34 }
 0x111   : > { %v2095_v55 = vpack.c.bf16 %v1513_v51, %v1512_v52  ;;  %v3595_v43 = vunpack.c.h.bf16 %v3687_v35  ;;  %v3594_v50 = vunpack.c.l.bf16 %v3687_v35  ;;  %v3647_v51 = vld [vmem:[%s4359_s26 + $0x60] sm:$0xff]  }
 0x112   : > { %v1472_v58 = vpop.permute.xlu1 %1471  ;;  %v1467_v59 = vpop.permute.xlu0 %1466  ;;  %v3678_v52 = vld [vmem:[%s4371_s27 + $0x60] sm:$0xff]   ;;  %v3430_v0 = vunpack.c.l.bf16 %v3647_v51 }
 0x113   : > { %v1545_v2 = vmul.f32 %v1472_v58, %v1097_v40  ;;  %v1544_v3 = vmul.f32 %v1467_v59, %v1096_v44  ;;  %3700 = vmatprep.subr.bf16.mxu0 %v2095_v55  ;;  %v3530_v40 = vunpack.c.l.bf16 %v3671_v23  ;;  %v1094_v55 = vmax.f32 %v1030_v31, 0.0 }
 0x114   : > { %v1015_v58 = vadd.f32 %v3595_v43, %v3467_v42  ;;  %v3431_v59 = vunpack.c.h.bf16 %v3647_v51  ;;  %v1014_v63 = vadd.f32 %v3594_v50, %v3466_v49  ;;  %v3558_v1 = vunpack.c.l.bf16 %v3678_v52  ;;  %v3686_v42 = vld [vmem:[%s4371_s27 + $0xa0] sm:$0xff]  }
 0x115   : > { %v2111_v6 = vpack.c.bf16 %v1545_v2, %v1544_v3  ;;  %v982_v56 = vadd.f32 %v3530_v40, %v3402_v39  ;;  %v3591_v50 = vunpack.c.h.bf16 %v3686_v42 }
 0x116   : > { %v1232_v10 = vpop.permute.xlu1 %1231  ;;  %v1227_v11 = vpop.permute.xlu0 %1226  ;;  %v1079_v9 = vmax.f32 %v1015_v58, 0.0  ;;  %v1078_v15 = vmax.f32 %v1014_v63, 0.0  ;;  %v3677_v58 = vld [vmem:[%s4371_s27 + $0x58] sm:$0xff]  }
 0x117   : > { %v1497_v17 = vmul.f32 %v1232_v10, %v1049_v60  ;;  %v1496_v18 = vmul.f32 %v1227_v11, %v1048_v4  ;;  %3812 = vmatprep.subr.bf16.mxu1 %v2111_v6  ;;  %v3559_v60 = vunpack.c.h.bf16 %v3678_v52  ;;  %v1047_v4 = vmax.f32 %v983_v48, 0.0  ;;  %v3663_v6 = vld [vmem:[%s4359_s26 + $0xe0] sm:$0xff]  }
 0x118   : > { %v1046_v5 = vmax.f32 %v982_v56, 0.0  ;;  %v3639_v11 = vld [vmem:[%s4359_s26 + $0x20] sm:$0xff]   ;;  %v3590_v52 = vunpack.c.l.bf16 %v3686_v42 }
 0x119   : > { %v2087_v24 = vpack.c.bf16 %v1497_v17, %v1496_v18  ;;  %v997_v10 = vadd.f32 %v3559_v60, %v3431_v59  ;;  %v996_v17 = vadd.f32 %v3558_v1, %v3430_v0  ;;  %v3495_v18 = vunpack.c.h.bf16 %v3663_v6 }
 0x11a   : > { %v1392_v27 = vpop.permute.xlu1 %1391  ;;  %v1387_v29 = vpop.permute.xlu0 %1386  ;;  %v3399_v26 = vunpack.c.h.bf16 %v3639_v11 }
 0x11b   : > { %v1529_v36 = vmul.f32 %v1392_v27, %v1081_v19  ;;  %v1528_v37 = vmul.f32 %v1387_v29, %v1080_v20  ;;  %3701 = vmatpush3.bf16.msra.mxu0 %v2087_v24  ;;  %v3623_v19 = vunpack.c.h.bf16 %v3694_v7  ;;  %v3670_v20 = vld [vmem:[%s4371_s27 + $0x20] sm:$0xff]   ;;  %v3494_v24 = vunpack.c.l.bf16 %v3663_v6 }
 0x11c   : > { %v3527_v29 = vunpack.c.h.bf16 %v3670_v20  ;;  %v3526_v31 = vunpack.c.l.bf16 %v3670_v20  ;;  %v1061_v34 = vmax.f32 %v997_v10, 0.0  ;;  %v1060_v39 = vmax.f32 %v996_v17, 0.0 }
 0x11d   : > { %v2103_v41 = vpack.c.bf16 %v1529_v36, %v1528_v37  ;;  %v1029_v35 = vadd.f32 %v3623_v19, %v3495_v18 }
 0x11e   : > { %v1302_v44 = vpop.permute.xlu1 %1301  ;;  %v1297_v45 = vpop.permute.xlu0 %1296 }
 0x11f   : > { %v1511_v53 = vmul.f32 %v1302_v44, %v1063_v25  ;;  %v1510_v54 = vmul.f32 %v1297_v45, %v1062_v30  ;;  %3813 = vmatpush3.bf16.msra.mxu1 %v2103_v41  ;;  %v3622_v25 = vunpack.c.l.bf16 %v3694_v7  ;;  %v3398_v30 = vunpack.c.l.bf16 %v3639_v11  ;;  %v3655_v41 = vld [vmem:[%s4359_s26 + $0xa0] sm:$0xff]  }
 0x120   : > { %v981_v44 = vadd.f32 %v3527_v29, %v3399_v26  ;;  %v3463_v49 = vunpack.c.h.bf16 %v3655_v41  ;;  %v3462_v51 = vunpack.c.l.bf16 %v3655_v41  ;;  %v3638_v26 = vld [vmem:[%s4359_s26 + $0x18] sm:$0xff]  }
 0x121   : > { %v2094_v57 = vpack.c.bf16 %v1511_v53, %v1510_v54  ;;  %v1028_v40 = vadd.f32 %v3622_v25, %v3494_v24  ;;  %v980_v45 = vadd.f32 %v3526_v31, %v3398_v30 }
 0x122   : > { %v1462_v61 = vpop.permute.xlu1 %1461  ;;  %v1457_v62 = vpop.permute.xlu0 %1456  ;;  %v1045_v60 = vmax.f32 %v981_v44, 0.0  ;;  %v1013_v1 = vadd.f32 %v3591_v50, %v3463_v49  ;;  %v3685_v44 = vld [vmem:[%s4371_s27 + $0x98] sm:$0xff]   ;;  %v3645_v49 = vld [vmem:[%s4359_s26 + $0x50] sm:$0xff]  }
 0x123   : > { %v1543_v2 = vmul.f32 %v1462_v61, %v1095_v46  ;;  %v1542_v3 = vmul.f32 %v1457_v62, %v1094_v55  ;;  %3702 = vmatprep.subr.bf16.mxu0 %v2094_v57  ;;  %v1093_v55 = vmax.f32 %v1029_v35, 0.0  ;;  %v1092_v56 = vmax.f32 %v1028_v40, 0.0  ;;  %v3646_v57 = vld [vmem:[%s4359_s26 + $0x58] sm:$0xff]  }
 0x124   : > { %v1044_v61 = vmax.f32 %v980_v45, 0.0  ;;  %v3662_v62 = vld [vmem:[%s4359_s26 + $0xd8] sm:$0xff]   ;;  %v1077_v19 = vmax.f32 %v1013_v1, 0.0 }
 0x125   : > { %v2110_v8 = vpack.c.bf16 %v1543_v2, %v1542_v3  ;;  %v1012_v2 = vadd.f32 %v3590_v52, %v3462_v51  ;;  %v3427_v3 = vunpack.c.h.bf16 %v3646_v57  ;;  %v3491_v10 = vunpack.c.h.bf16 %v3662_v62 }
 0x126   : > { %v1222_v13 = vpop.permute.xlu1 %1221  ;;  %v1217_v14 = vpop.permute.xlu0 %1216 }
 0x127   : > { %v1495_v21 = vmul.f32 %v1222_v13, %v1047_v4  ;;  %v1494_v23 = vmul.f32 %v1217_v14, %v1046_v5  ;;  %3814 = vmatprep.subr.bf16.mxu1 %v2110_v8  ;;  %v3555_v4 = vunpack.c.h.bf16 %v3677_v58  ;;  %v3693_v5 = vld [vmem:[%s4371_s27 + $0xd8] sm:$0xff]   ;;  %v3426_v8 = vunpack.c.l.bf16 %v3646_v57 }
 0x128   : > { %v3619_v13 = vunpack.c.h.bf16 %v3693_v5  ;;  %v3490_v14 = vunpack.c.l.bf16 %v3662_v62  ;;  %v1076_v20 = vmax.f32 %v1012_v2, 0.0 }
 0x129   : > { %v2086_v27 = vpack.c.bf16 %v1495_v21, %v1494_v23  ;;  %v995_v24 = vadd.f32 %v3555_v4, %v3427_v3 }
 0x12a   : > { %v1382_v32 = vpop.permute.xlu1 %1381  ;;  %v1377_v33 = vpop.permute.xlu0 %1376  ;;  %v1027_v30 = vadd.f32 %v3619_v13, %v3491_v10  ;;  %v3661_v10 = vld [vmem:[%s4359_s26 + $0xd0] sm:$0xff]  }
 0x12b   : > { %v1527_v36 = vmul.f32 %v1382_v32, %v1079_v9  ;;  %v1526_v37 = vmul.f32 %v1377_v33, %v1078_v15  ;;  %3703 = vmatpush3.bf16.msra.mxu0 %v2086_v27  ;;  %v3554_v9 = vunpack.c.l.bf16 %v3677_v58  ;;  %v3618_v15 = vunpack.c.l.bf16 %v3693_v5  ;;  %v3669_v27 = vld [vmem:[%s4371_s27 + $0x18] sm:$0xff]  }
 0x12c   : > { %v3523_v35 = vunpack.c.h.bf16 %v3669_v27  ;;  %v1059_v41 = vmax.f32 %v995_v24, 0.0 }
 0x12d   : > { %v2102_v43 = vpack.c.bf16 %v1527_v36, %v1526_v37  ;;  %v994_v25 = vadd.f32 %v3554_v9, %v3426_v8  ;;  %v1026_v31 = vadd.f32 %v3618_v15, %v3490_v14  ;;  %v3394_v36 = vunpack.c.l.bf16 %v3638_v26 }
 0x12e   : > { %v1292_v46 = vpop.permute.xlu1 %1291  ;;  %v1287_v48 = vpop.permute.xlu0 %1286  ;;  %v3522_v37 = vunpack.c.l.bf16 %v3669_v27 }
 0x12f   : > { %v1509_v53 = vmul.f32 %v1292_v46, %v1061_v34  ;;  %v1508_v54 = vmul.f32 %v1287_v48, %v1060_v39  ;;  %3815 = vmatpush3.bf16.msra.mxu1 %v2102_v43  ;;  %v3395_v34 = vunpack.c.h.bf16 %v3638_v26  ;;  %v1058_v42 = vmax.f32 %v994_v25, 0.0  ;;  %v3654_v43 = vld [vmem:[%s4359_s26 + $0x98] sm:$0xff]  }
 0x130   : > { %v1091_v46 = vmax.f32 %v1027_v30, 0.0  ;;  %v1090_v48 = vmax.f32 %v1026_v31, 0.0  ;;  %v3668_v30 = vld [vmem:[%s4371_s27 + $0x10] sm:$0xff]  }
 0x131   : > { %v2093_v59 = vpack.c.bf16 %v1509_v53, %v1508_v54  ;;  %v979_v52 = vadd.f32 %v3523_v35, %v3395_v34  ;;  %v978_v53 = vadd.f32 %v3522_v37, %v3394_v36  ;;  %v3459_v54 = vunpack.c.h.bf16 %v3654_v43  ;;  %v3653_v34 = vld [vmem:[%s4359_s26 + $0x90] sm:$0xff]  }
 0x132   : > { %v1452_v63 = vpop.permute.xlu1 %1451  ;;  %v1447_v0 = vpop.permute.xlu0 %1446 }
 0x133   : > { %v1541_v6 = vmul.f32 %v1452_v63, %v1093_v55  ;;  %v1540_v7 = vmul.f32 %v1447_v0, %v1092_v56  ;;  %3704 = vmatprep.subr.bf16.mxu0 %v2093_v59  ;;  %v3587_v55 = vunpack.c.h.bf16 %v3685_v44  ;;  %v3676_v56 = vld [vmem:[%s4371_s27 + $0x50] sm:$0xff]   ;;  %v3458_v59 = vunpack.c.l.bf16 %v3654_v43 }
 0x134   : > { %v3551_v63 = vunpack.c.h.bf16 %v3676_v56  ;;  %v3422_v0 = vunpack.c.l.bf16 %v3645_v49  ;;  %v3550_v1 = vunpack.c.l.bf16 %v3676_v56  ;;  %v1043_v4 = vmax.f32 %v979_v52, 0.0 }
 0x135   : > { %v2109_v11 = vpack.c.bf16 %v1541_v6, %v1540_v7  ;;  %v1042_v5 = vmax.f32 %v978_v53, 0.0  ;;  %v1011_v8 = vadd.f32 %v3587_v55, %v3459_v54 }
 0x136   : > { %v1212_v17 = vpop.permute.xlu1 %1211  ;;  %v1207_v18 = vpop.permute.xlu0 %1206  ;;  %v992_v15 = vadd.f32 %v3550_v1, %v3422_v0 }
 0x137   : > { %v1493_v21 = vmul.f32 %v1212_v17, %v1045_v60  ;;  %v1492_v23 = vmul.f32 %v1207_v18, %v1044_v61  ;;  %3816 = vmatprep.subr.bf16.mxu1 %v2109_v11  ;;  %v3586_v60 = vunpack.c.l.bf16 %v3685_v44  ;;  %v3423_v61 = vunpack.c.h.bf16 %v3645_v49  ;;  %v3692_v11 = vld [vmem:[%s4371_s27 + $0xd0] sm:$0xff]  }
 0x138   : > { %v1075_v26 = vmax.f32 %v1011_v8, 0.0 }
 0x139   : > { %v2085_v29 = vpack.c.bf16 %v1493_v21, %v1492_v23  ;;  %v1010_v9 = vadd.f32 %v3586_v60, %v3458_v59  ;;  %v993_v14 = vadd.f32 %v3551_v63, %v3423_v61  ;;  %v3486_v21 = vunpack.c.l.bf16 %v3661_v10  ;;  %v3644_v61 = vld [vmem:[%s4359_s26 + $0x48] sm:$0xff]  }
 0x13a   : > { %v1372_v32 = vpop.permute.xlu1 %1371  ;;  %v1367_v33 = vpop.permute.xlu0 %1366  ;;  %v3614_v23 = vunpack.c.l.bf16 %v3692_v11 }
 0x13b   : > { %v1525_v39 = vmul.f32 %v1372_v32, %v1077_v19  ;;  %v1524_v40 = vmul.f32 %v1367_v33, %v1076_v20  ;;  %3705 = vmatpush3.bf16.msra.mxu0 %v2085_v29  ;;  %v3487_v19 = vunpack.c.h.bf16 %v3661_v10  ;;  %v3615_v20 = vunpack.c.h.bf16 %v3692_v11  ;;  %v3637_v29 = vld [vmem:[%s4359_s26 + $0x10] sm:$0xff]  }
 0x13c   : > { %v1074_v27 = vmax.f32 %v1010_v9, 0.0  ;;  %v1057_v32 = vmax.f32 %v993_v14, 0.0  ;;  %v1056_v33 = vmax.f32 %v992_v15, 0.0  ;;  %v3691_v14 = vld [vmem:[%s4371_s27 + $0xc8] sm:$0xff]  }
 0x13d   : > { %v2101_v45 = vpack.c.bf16 %v1525_v39, %v1524_v40  ;;  %v1025_v37 = vadd.f32 %v3615_v20, %v3487_v19  ;;  %v1024_v39 = vadd.f32 %v3614_v23, %v3486_v21  ;;  %v3391_v40 = vunpack.c.h.bf16 %v3637_v29  ;;  %v3636_v19 = vld [vmem:[%s4359_s26 + $0x8] sm:$0xff]  }
 0x13e   : > { %v1282_v50 = vpop.permute.xlu1 %1281  ;;  %v1277_v51 = vpop.permute.xlu0 %1276 }
 0x13f   : > { %v1507_v57 = vmul.f32 %v1282_v50, %v1059_v41  ;;  %v1506_v58 = vmul.f32 %v1277_v51, %v1058_v42  ;;  %3817 = vmatpush3.bf16.msra.mxu1 %v2101_v45  ;;  %v3519_v41 = vunpack.c.h.bf16 %v3668_v30  ;;  %v3684_v42 = vld [vmem:[%s4371_s27 + $0x90] sm:$0xff]   ;;  %v3390_v45 = vunpack.c.l.bf16 %v3637_v29 }
 0x140   : > { %v3583_v50 = vunpack.c.h.bf16 %v3684_v42  ;;  %v3454_v51 = vunpack.c.l.bf16 %v3653_v34  ;;  %v3582_v52 = vunpack.c.l.bf16 %v3684_v42  ;;  %v1089_v55 = vmax.f32 %v1025_v37, 0.0 }
 0x141   : > { %v2092_v62 = vpack.c.bf16 %v1507_v57, %v1506_v58  ;;  %v1088_v56 = vmax.f32 %v1024_v39, 0.0  ;;  %v977_v59 = vadd.f32 %v3519_v41, %v3391_v40 }
 0x142   : > { %v1442_v2 = vpop.permute.xlu1 %1441  ;;  %v1437_v3 = vpop.permute.xlu0 %1436  ;;  %v1008_v1 = vadd.f32 %v3582_v52, %v3454_v51 }
 0x143   : > { %v1539_v6 = vmul.f32 %v1442_v2, %v1091_v46  ;;  %v1538_v7 = vmul.f32 %v1437_v3, %v1090_v48  ;;  %3706 = vmatprep.subr.bf16.mxu0 %v2092_v62  ;;  %v3518_v46 = vunpack.c.l.bf16 %v3668_v30  ;;  %v3455_v48 = vunpack.c.h.bf16 %v3653_v34  ;;  %v3675_v62 = vld [vmem:[%s4371_s27 + $0x48] sm:$0xff]  }
 0x144   : > { %v1041_v10 = vmax.f32 %v977_v59, 0.0 }
 0x145   : > { %v2108_v13 = vpack.c.bf16 %v1539_v6, %v1538_v7  ;;  %v976_v60 = vadd.f32 %v3518_v46, %v3390_v45  ;;  %v1009_v0 = vadd.f32 %v3583_v50, %v3455_v48  ;;  %v3418_v6 = vunpack.c.l.bf16 %v3644_v61  ;;  %v3652_v48 = vld [vmem:[%s4359_s26 + $0x88] sm:$0xff]  }
 0x146   : > { %v1202_v17 = vpop.permute.xlu1 %1201  ;;  %v1197_v18 = vpop.permute.xlu0 %1196  ;;  %v3546_v7 = vunpack.c.l.bf16 %v3675_v62 }
 0x147   : > { %v1491_v24 = vmul.f32 %v1202_v17, %v1043_v4  ;;  %v1490_v25 = vmul.f32 %v1197_v18, %v1042_v5  ;;  %3818 = vmatprep.subr.bf16.mxu1 %v2108_v13  ;;  %v3419_v4 = vunpack.c.h.bf16 %v3644_v61  ;;  %v3547_v5 = vunpack.c.h.bf16 %v3675_v62  ;;  %v3660_v13 = vld [vmem:[%s4359_s26 + $0xc8] sm:$0xff]  }
 0x148   : > { %v1040_v11 = vmax.f32 %v976_v60, 0.0  ;;  %v1073_v17 = vmax.f32 %v1009_v0, 0.0  ;;  %v1072_v18 = vmax.f32 %v1008_v1, 0.0  ;;  %v3674_v0 = vld [vmem:[%s4371_s27 + $0x40] sm:$0xff]  }
 0x149   : > { %v2084_v31 = vpack.c.bf16 %v1491_v24, %v1490_v25  ;;  %v991_v23 = vadd.f32 %v3547_v5, %v3419_v4  ;;  %v990_v24 = vadd.f32 %v3546_v7, %v3418_v6  ;;  %v3483_v25 = vunpack.c.h.bf16 %v3660_v13  ;;  %v3659_v4 = vld [vmem:[%s4359_s26 + $0xc0] sm:$0xff]  }
 0x14a   : > { %v1362_v35 = vpop.permute.xlu1 %1361  ;;  %v1357_v36 = vpop.permute.xlu0 %1356 }
 0x14b   : > { %v1523_v43 = vmul.f32 %v1362_v35, %v1075_v26  ;;  %v1522_v44 = vmul.f32 %v1357_v36, %v1074_v27  ;;  %3707 = vmatpush3.bf16.msra.mxu0 %v2084_v31  ;;  %v3611_v26 = vunpack.c.h.bf16 %v3691_v14  ;;  %v3667_v27 = vld [vmem:[%s4371_s27 + $0x8] sm:$0xff]   ;;  %v3482_v31 = vunpack.c.l.bf16 %v3660_v13 }
 0x14c   : > { %v3515_v35 = vunpack.c.h.bf16 %v3667_v27  ;;  %v3386_v36 = vunpack.c.l.bf16 %v3636_v19  ;;  %v3514_v37 = vunpack.c.l.bf16 %v3667_v27  ;;  %v1055_v41 = vmax.f32 %v991_v23, 0.0 }
 0x14d   : > { %v2100_v49 = vpack.c.bf16 %v1523_v43, %v1522_v44  ;;  %v1054_v42 = vmax.f32 %v990_v24, 0.0  ;;  %v1023_v45 = vadd.f32 %v3611_v26, %v3483_v25 }
 0x14e   : > { %v1272_v53 = vpop.permute.xlu1 %1271  ;;  %v1267_v54 = vpop.permute.xlu0 %1266  ;;  %v974_v52 = vadd.f32 %v3514_v37, %v3386_v36 }
 0x14f   : > { %v1505_v57 = vmul.f32 %v1272_v53, %v1057_v32  ;;  %v1504_v58 = vmul.f32 %v1267_v54, %v1056_v33  ;;  %3819 = vmatpush3.bf16.msra.mxu1 %v2100_v49  ;;  %v3610_v32 = vunpack.c.l.bf16 %v3691_v14  ;;  %v3387_v33 = vunpack.c.h.bf16 %v3636_v19  ;;  %v3683_v49 = vld [vmem:[%s4371_s27 + $0x88] sm:$0xff]  }
 0x150   : > { %v1087_v61 = vmax.f32 %v1023_v45, 0.0 }
 0x151   : > { %v2091_v63 = vpack.c.bf16 %v1505_v57, %v1504_v58  ;;  %v1022_v46 = vadd.f32 %v3610_v32, %v3482_v31  ;;  %v975_v51 = vadd.f32 %v3515_v35, %v3387_v33  ;;  %v3450_v57 = vunpack.c.l.bf16 %v3652_v48  ;;  %v3381_v33 = vld [vmem:[%s4359_s26] sm:$0xff]  }
 0x152   : > { %v1432_v2 = vpop.permute.xlu1 %1431  ;;  %v1427_v3 = vpop.permute.xlu0 %1426  ;;  %v3578_v58 = vunpack.c.l.bf16 %v3683_v49 }
 0x153   : > { %v1537_v8 = vmul.f32 %v1432_v2, %v1089_v55  ;;  %v1536_v9 = vmul.f32 %v1427_v3, %v1088_v56  ;;  %3708 = vmatprep.subr.bf16.mxu0 %v2091_v63  ;;  %v3451_v55 = vunpack.c.h.bf16 %v3652_v48  ;;  %v3579_v56 = vunpack.c.h.bf16 %v3683_v49  ;;  %v3643_v63 = vld [vmem:[%s4359_s26 + $0x40] sm:$0xff]  }
 0x154   : > { %v1086_v62 = vmax.f32 %v1022_v46, 0.0  ;;  %v1039_v2 = vmax.f32 %v975_v51, 0.0  ;;  %v1038_v3 = vmax.f32 %v974_v52, 0.0  ;;  %v3682_v51 = vld [vmem:[%s4371_s27 + $0x80] sm:$0xff]  }
 0x155   : > { %v2107_v15 = vpack.c.bf16 %v1537_v8, %v1536_v9  ;;  %v1007_v7 = vadd.f32 %v3579_v56, %v3451_v55  ;;  %v1006_v8 = vadd.f32 %v3578_v58, %v3450_v57  ;;  %v3415_v9 = vunpack.c.h.bf16 %v3643_v63 }
 0x156   : > { %v1192_v20 = vpop.permute.xlu1 %1191  ;;  %v1187_v21 = vpop.permute.xlu0 %1186 }
 0x157   : > { %v1489_v29 = vmul.f32 %v1192_v20, %v1041_v10  ;;  %v1488_v30 = vmul.f32 %v1187_v21, %v1040_v11  ;;  %3820 = vmatprep.subr.bf16.mxu1 %v2107_v15  ;;  %v3543_v10 = vunpack.c.h.bf16 %v3674_v0  ;;  %v3690_v11 = vld [vmem:[%s4371_s27 + $0xc0] sm:$0xff]   ;;  %v3414_v15 = vunpack.c.l.bf16 %v3643_v63 }
 0x158   : > { %v3607_v20 = vunpack.c.h.bf16 %v3690_v11  ;;  %v3478_v21 = vunpack.c.l.bf16 %v3659_v4  ;;  %v3606_v23 = vunpack.c.l.bf16 %v3690_v11  ;;  %v1071_v26 = vmax.f32 %v1007_v7, 0.0 }
 0x159   : > { %v2083_v34 = vpack.c.bf16 %v1489_v29, %v1488_v30  ;;  %v1070_v27 = vmax.f32 %v1006_v8, 0.0  ;;  %v989_v31 = vadd.f32 %v3543_v10, %v3415_v9 }
 0x15a   : > { %v1352_v39 = vpop.permute.xlu1 %1351  ;;  %v1347_v40 = vpop.permute.xlu0 %1346  ;;  %v1020_v37 = vadd.f32 %v3606_v23, %v3478_v21 }
 0x15b   : > { %v1521_v43 = vmul.f32 %v1352_v39, %v1073_v17  ;;  %v1520_v44 = vmul.f32 %v1347_v40, %v1072_v18  ;;  %3709 = vmatpush3.bf16.msra.mxu0 %v2083_v34  ;;  %v3542_v17 = vunpack.c.l.bf16 %v3674_v0  ;;  %v3479_v18 = vunpack.c.h.bf16 %v3659_v4  ;;  %v3509_v34 = vld [vmem:[%s4371_s27] sm:$0xff]  }
 0x15c   : > { %v1053_v48 = vmax.f32 %v989_v31, 0.0  ;;  %v3574_v0 = vunpack.c.l.bf16 %v3682_v51 }
 0x15d   : > { %v2099_v50 = vpack.c.bf16 %v1521_v43, %v1520_v44  ;;  %v988_v32 = vadd.f32 %v3542_v17, %v3414_v15  ;;  %v1021_v36 = vadd.f32 %v3607_v20, %v3479_v18  ;;  %v3382_v43 = vunpack.c.l.bf16 %v3381_v33 }
 0x15e   : > { %v1262_v53 = vpop.permute.xlu1 %1261  ;;  %v1257_v54 = vpop.permute.xlu0 %1256  ;;  %v3510_v44 = vunpack.c.l.bf16 %v3509_v34  ;;  %v1555_v15 = vadd.s32 16, %v4456_v12  ;;  %v1556_v17 = vadd.s32 24, %v4456_v12 }
 0x15f   : > { %v1503_v59 = vmul.f32 %v1262_v53, %v1055_v41  ;;  %v1502_v60 = vmul.f32 %v1257_v54, %v1054_v42  ;;  %3821 = vmatpush3.bf16.msra.mxu1 %v2099_v50  ;;  %v3383_v41 = vunpack.c.h.bf16 %v3381_v33  ;;  %v3511_v42 = vunpack.c.h.bf16 %v3509_v34  ;;  %v3651_v50 = vld [vmem:[%s4359_s26 + $0x80] sm:$0xff]  }
 0x160   : > { %v1052_v49 = vmax.f32 %v988_v32, 0.0  ;;  %v1085_v53 = vmax.f32 %v1021_v36, 0.0  ;;  %v1084_v54 = vmax.f32 %v1020_v37, 0.0  ;;  %v972_v58 = vadd.f32 %v3510_v44, %v3382_v43 }
 0x161   : > { %v2090_v1 = vpack.c.bf16 %v1503_v59, %v1502_v60  ;;  %v973_v57 = vadd.f32 %v3511_v42, %v3383_v41  ;;  %v3447_v59 = vunpack.c.h.bf16 %v3651_v50  ;;  %v3575_v60 = vunpack.c.h.bf16 %v3682_v51 }
 0x162   : > { %v1422_v5 = vpop.permute.xlu1 %1421  ;;  %v1417_v6 = vpop.permute.xlu0 %1416  ;;  %v3446_v63 = vunpack.c.l.bf16 %v3651_v50  ;;  %vm1610_vm8 = vcmp.eq.s32.totalorder %v1555_v15, %v4469_v28  ;;  %vm1614_vm9 = vcmp.eq.s32.totalorder %v1556_v17, %v4469_v28  ;;  %vm1612_vm14 = vcmp.eq.s32.totalorder %v1555_v15, %v4479_v38 }
 0x163   : > { %v1535_v13 = vmul.f32 %v1422_v5, %v1087_v61  ;;  %v1534_v14 = vmul.f32 %v1417_v6, %v1086_v62  ;;  %3710 = vmatprep.subr.bf16.mxu0 %v2090_v1  ;;  %v1587_v1 = vsub.s32 0, %v4456_v12  ;;  %v1037_v5 = vmax.f32 %v973_v57, 0.0  ;;  %vm3248_vm13 = vmpackc.low %vm1614_vm9, %vm1610_vm8 }
 0x164   : > { %v1036_v6 = vmax.f32 %v972_v58, 0.0  ;;  %v1005_v9 = vadd.f32 %v3575_v60, %v3447_v59  ;;  %v1004_v10 = vadd.f32 %v3574_v0, %v3446_v63  ;;  %vm1616_vm15 = vcmp.eq.s32.totalorder %v1556_v17, %v4479_v38 }
 0x165   : > { %v2106_v19 = vpack.c.bf16 %v1535_v13, %v1534_v14  ;;  %v4545_v11 = vrot.slane %v4458_v16, %v1587_v1  ;;  %v1595_v13 = vsub.s32 2, %v4456_v12  ;;  %v1557_v32 = vadd.s32 32, %v4456_v12  ;;  %vm3312_vm3 = vmpackc.low %vm1616_vm15, %vm1612_vm14 }
 0x166   : > { %v1182_v24 = vpop.permute.xlu1 %1181  ;;  %v1177_v25 = vpop.permute.xlu0 %1176  ;;  %v1069_v23 = vmax.f32 %v1005_v9, 0.0  ;;  %v1558_v33 = vadd.s32 40, %v4456_v12  ;;  %v1560_v34 = vadd.s32 56, %v4456_v12  ;;  %v1562_v36 = vadd.s32 72, %v4456_v12 }
 0x167   : > { %v1487_v29 = vmul.f32 %v1182_v24, %v1039_v2  ;;  %v1486_v30 = vmul.f32 %v1177_v25, %v1038_v3  ;;  %3822 = vmatprep.subr.bf16.mxu1 %v2106_v19  ;;  %v1068_v24 = vmax.f32 %v1004_v10, 0.0  ;;  %vm1601_vm6 = vcmp.eq.s32.totalorder %v4456_v12, %v4545_v11 }
 0x168   : > { %vm1605_vm7 = vcmp.eq.s32.totalorder %v4464_v22, %v4545_v11  ;;  %v4555_v25 = vrot.slane %v4458_v16, %v1595_v13  ;;  %vm1609_vm1 = vcmp.eq.s32.totalorder %v1555_v15, %v4545_v11  ;;  %vm1613_vm2 = vcmp.eq.s32.totalorder %v1556_v17, %v4545_v11 }
 0x169   : > { %v2082_v35 = vpack.c.bf16 %v1487_v29, %v1486_v30  ;;  %vm3246_vm10 = vmpackc.low %vm1605_vm7, %vm1601_vm6  ;;  %vm1618_vm4 = vcmp.eq.s32.totalorder %v1557_v32, %v4469_v28  ;;  %vm1622_vm5 = vcmp.eq.s32.totalorder %v1558_v33, %v4469_v28  ;;  %vm1621_vm14 = vcmp.eq.s32.totalorder %v1558_v33, %v4545_v11 }
 0x16a   : > { %v1342_v39 = vpop.permute.xlu1 %1341  ;;  %v1337_v40 = vpop.permute.xlu0 %1336  ;;  %vm1603_vm11 = vcmp.eq.s32.totalorder %v4456_v12, %v4555_v25  ;;  %vm1607_vm12 = vcmp.eq.s32.totalorder %v4464_v22, %v4555_v25  ;;  %vm3250_vm6 = vmpackc.low %vm1613_vm2, %vm1609_vm1  ;;  %vm1611_vm7 = vcmp.eq.s32.totalorder %v1555_v15, %v4555_v25  ;;  %vm1615_vm8 = vcmp.eq.s32.totalorder %v1556_v17, %v4555_v25 }
 0x16b   : > { %v1519_v45 = vmul.f32 %v1342_v39, %v1071_v26  ;;  %v1518_v46 = vmul.f32 %v1337_v40, %v1070_v27  ;;  %3711 = vmatpush3.bf16.msra.mxu0 %v2082_v35  ;;  %vm3310_vm0 = vmpackc.low %vm1607_vm12, %vm1603_vm11  ;;  %vm1624_vm11 = vcmp.eq.s32.totalorder %v1558_v33, %v4479_v38  ;;  %v1559_v22 = vadd.s32 48, %v4456_v12 }
 0x16c   : > { %vm3252_vm9 = vmpackc.low %vm1622_vm5, %vm1618_vm4  ;;  %vm1630_vm1 = vcmp.eq.s32.totalorder %v1560_v34, %v4469_v28  ;;  %vm1623_vm4 = vcmp.eq.s32.totalorder %v1558_v33, %v4555_v25  ;;  %v1561_v35 = vadd.s32 64, %v4456_v12  ;;  %v1563_v37 = vadd.s32 80, %v4456_v12 }
 0x16d   : > { %v2098_v52 = vpack.c.bf16 %v1519_v45, %v1518_v46  ;;  %vm3314_vm12 = vmpackc.low %vm1615_vm8, %vm1611_vm7  ;;  %vm1632_vm7 = vcmp.eq.s32.totalorder %v1560_v34, %v4479_v38  ;;  %v1564_v39 = vadd.s32 88, %v4456_v12  ;;  %v1565_v40 = vadd.s32 96, %v4456_v12 }
 0x16e   : > { %v1252_v55 = vpop.permute.xlu1 %1251  ;;  %v1247_v56 = vpop.permute.xlu0 %1246  ;;  %v1566_v41 = vadd.s32 104, %v4456_v12  ;;  %v1567_v42 = vadd.s32 112, %v4456_v12  ;;  %v1568_v43 = vadd.s32 120, %v4456_v12  ;;  %v1569_v44 = vadd.s32 128, %v4456_v12 }
 0x16f   : > { %v1501_v61 = vmul.f32 %v1252_v55, %v1053_v48  ;;  %v1500_v62 = vmul.f32 %v1247_v56, %v1052_v49  ;;  %3823 = vmatpush3.bf16.msra.mxu1 %v2098_v52  ;;  %v1570_v45 = vadd.s32 136, %v4456_v12  ;;  %v1571_v46 = vadd.s32 144, %v4456_v12 }
 0x170   : > { %v1572_v48 = vadd.s32 152, %v4456_v12  ;;  %v1573_v49 = vadd.s32 160, %v4456_v12  ;;  %v1574_v50 = vadd.s32 168, %v4456_v12  ;;  %v1575_v51 = vadd.s32 176, %v4456_v12 }
 0x171   : > { %v2089_v2 = vpack.c.bf16 %v1501_v61, %v1500_v62  ;;  %v1576_v52 = vadd.s32 184, %v4456_v12  ;;  %v1579_v55 = vadd.s32 208, %v4456_v12  ;;  %v1580_v56 = vadd.s32 216, %v4456_v12 }
 0x172   : > { %v1412_v3 = vpop.permute.xlu1 %1411  ;;  %v1407_v4 = vpop.permute.xlu0 %1406  ;;  %v1581_v57 = vadd.s32 224, %v4456_v12  ;;  %v1582_v58 = vadd.s32 232, %v4456_v12  ;;  %v1583_v59 = vadd.s32 240, %v4456_v12  ;;  %v1584_v60 = vadd.s32 248, %v4456_v12 }
 0x173   : > { %v1533_v7 = vmul.f32 %v1412_v3, %v1085_v53  ;;  %v1532_v8 = vmul.f32 %v1407_v4, %v1084_v54  ;;  %3712 = vmatprep.subr.bf16.mxu0 %v2089_v2  ;;  %v1577_v53 = vadd.s32 192, %v4456_v12  ;;  %v1578_v54 = vadd.s32 200, %v4456_v12  ;;  %v2049_v2 = vld [vmem:[#allocation2 + $0xb0] sm:$0xff] }
 0x175   : > { %v2105_v14 = vpack.c.bf16 %v1533_v7, %v1532_v8 }
 0x176   : > { %v1172_v18 = vpop.permute.xlu1 %1171  ;;  %v1167_v19 = vpop.permute.xlu0 %1166 }
 0x177   : > { %v1485_v20 = vmul.f32 %v1172_v18, %v1037_v5  ;;  %v1484_v21 = vmul.f32 %v1167_v19, %v1036_v6  ;;  %3824 = vmatprep.subr.bf16.mxu1 %v2105_v14 }
 0x179   : > { %v2081_v26 = vpack.c.bf16 %v1485_v20, %v1484_v21  ;;  %v2051_v21 = vld [vmem:[#allocation2 + $0xd8] sm:$0xff] }
 0x17a   : > { %v1332_v27 = vpop.permute.xlu1 %1331  ;;  %v1327_v29 = vpop.permute.xlu0 %1326 }
 0x17b   : > { %v1517_v30 = vmul.f32 %v1332_v27, %v1069_v23  ;;  %v1516_v31 = vmul.f32 %v1327_v29, %v1068_v24  ;;  %3713 = vmatpush3.bf16.msra.mxu0 %v2081_v26 }
 0x17d   : > { %v2097_v16 = vpack.c.bf16 %v1517_v30, %v1516_v31 }
 0x17e   : > { %3247 = vmatmul.mubr.msk.bf16.vlgmr.msra.gmra.mxu0 %vm3246_vm10, %v4167_v47  ;;  %vm1620_vm10 = vcmp.eq.s32.totalorder %v1557_v32, %v4479_v38 }
 0x17f   : > { %3825 = vmatpush3.bf16.msra.mxu1 %v2097_v16  ;;  %3249 = vmatprep.mubr.msk.bf16.mxu0 %vm3248_vm13, %v4167_v47  ;;  %vm1617_vm13 = vcmp.eq.s32.totalorder %v1557_v32, %v4545_v11  ;;  %vm3316_vm15 = vmpackc.low %vm1624_vm11, %vm1620_vm10  ;;  %vm1629_vm10 = vcmp.eq.s32.totalorder %v1560_v34, %v4545_v11  ;;  %v2052_v16 = vld [vmem:[#allocation2 + $0x18] sm:$0xff] }
 0x180   : > { %vm3254_vm2 = vmpackc.low %vm1621_vm14, %vm1617_vm13  ;;  %vm1638_vm13 = vcmp.eq.s32.totalorder %v1562_v36, %v4469_v28 }
 0x182   : > { %3311 = vmatmul.mubr.msk.bf16.vlgmr.msra.gmra.mxu1 %vm3310_vm0, %v4167_v47  ;;  %vm1626_vm0 = vcmp.eq.s32.totalorder %v1559_v22, %v4469_v28 }
 0x183   : > { %3313 = vmatprep.mubr.msk.bf16.mxu1 %vm3312_vm3, %v4167_v47  ;;  %vm1619_vm3 = vcmp.eq.s32.totalorder %v1557_v32, %v4555_v25  ;;  %vm3256_vm5 = vmpackc.low %vm1630_vm1, %vm1626_vm0  ;;  %vm1631_vm0 = vcmp.eq.s32.totalorder %v1560_v34, %v4555_v25 }
 0x184   : > { %vm3318_vm8 = vmpackc.low %vm1623_vm4, %vm1619_vm3  ;;  %vm1640_vm3 = vcmp.eq.s32.totalorder %v1562_v36, %v4479_v38 }
 0x186   : > { %3251 = vmatmul.mubr.msk.bf16.gmra.mxu0 %vm3250_vm6, %v4167_v47  ;;  %vm1628_vm6 = vcmp.eq.s32.totalorder %v1559_v22, %v4479_v38 }
 0x187   : > { %3253 = vmatprep.mubr.msk.bf16.mxu0 %vm3252_vm9, %v4167_v47  ;;  %vm1625_vm9 = vcmp.eq.s32.totalorder %v1559_v22, %v4545_v11  ;;  %vm3320_vm11 = vmpackc.low %vm1632_vm7, %vm1628_vm6  ;;  %vm1637_vm6 = vcmp.eq.s32.totalorder %v1562_v36, %v4545_v11 }
 0x188   : > { %vm3258_vm14 = vmpackc.low %vm1629_vm10, %vm1625_vm9  ;;  %vm1646_vm9 = vcmp.eq.s32.totalorder %v1564_v39, %v4469_v28 }
 0x18a   : > { %3315 = vmatmul.mubr.msk.bf16.gmra.mxu1 %vm3314_vm12, %v4167_v47  ;;  %vm1634_vm12 = vcmp.eq.s32.totalorder %v1561_v35, %v4469_v28 }
 0x18b   : > { %3317 = vmatprep.mubr.msk.bf16.mxu1 %vm3316_vm15, %v4167_v47  ;;  %vm1627_vm15 = vcmp.eq.s32.totalorder %v1559_v22, %v4555_v25  ;;  %vm3260_vm1 = vmpackc.low %vm1638_vm13, %vm1634_vm12  ;;  %vm1639_vm12 = vcmp.eq.s32.totalorder %v1562_v36, %v4555_v25 }
 0x18c   : > { %vm3322_vm4 = vmpackc.low %vm1631_vm0, %vm1627_vm15  ;;  %vm1648_vm15 = vcmp.eq.s32.totalorder %v1564_v39, %v4479_v38 }
 0x18e   : > { %3255 = vmatmul.mubr.msk.bf16.gmra.mxu0 %vm3254_vm2, %v4167_v47  ;;  %vm1636_vm2 = vcmp.eq.s32.totalorder %v1561_v35, %v4479_v38 }
 0x18f   : > { %3257 = vmatprep.mubr.msk.bf16.mxu0 %vm3256_vm5, %v4167_v47  ;;  %vm1633_vm5 = vcmp.eq.s32.totalorder %v1561_v35, %v4545_v11  ;;  %vm3324_vm7 = vmpackc.low %vm1640_vm3, %vm1636_vm2  ;;  %vm1645_vm2 = vcmp.eq.s32.totalorder %v1564_v39, %v4545_v11 }
 0x190   : > { %vm3262_vm10 = vmpackc.low %vm1637_vm6, %vm1633_vm5  ;;  %vm1654_vm5 = vcmp.eq.s32.totalorder %v1566_v41, %v4469_v28 }
 0x192   : > { %3319 = vmatmul.mubr.msk.bf16.gmra.mxu1 %vm3318_vm8, %v4167_v47  ;;  %vm1642_vm8 = vcmp.eq.s32.totalorder %v1563_v37, %v4469_v28 }
 0x193   : > { %3321 = vmatprep.mubr.msk.bf16.mxu1 %vm3320_vm11, %v4167_v47  ;;  %vm1635_vm11 = vcmp.eq.s32.totalorder %v1561_v35, %v4555_v25  ;;  %vm3264_vm13 = vmpackc.low %vm1646_vm9, %vm1642_vm8  ;;  %vm1647_vm8 = vcmp.eq.s32.totalorder %v1564_v39, %v4555_v25 }
 0x194   : > { %vm3326_vm0 = vmpackc.low %vm1639_vm12, %vm1635_vm11  ;;  %vm1656_vm11 = vcmp.eq.s32.totalorder %v1566_v41, %v4479_v38 }
 0x196   : > { %3259 = vmatmul.mubr.msk.bf16.gmra.mxu0 %vm3258_vm14, %v4167_v47  ;;  %vm1644_vm14 = vcmp.eq.s32.totalorder %v1563_v37, %v4479_v38 }
 0x197   : > { %3261 = vmatprep.mubr.msk.bf16.mxu0 %vm3260_vm1, %v4167_v47  ;;  %vm1641_vm1 = vcmp.eq.s32.totalorder %v1563_v37, %v4545_v11  ;;  %vm3328_vm3 = vmpackc.low %vm1648_vm15, %vm1644_vm14  ;;  %vm1653_vm14 = vcmp.eq.s32.totalorder %v1566_v41, %v4545_v11 }
 0x198   : > { %vm3266_vm6 = vmpackc.low %vm1645_vm2, %vm1641_vm1  ;;  %vm1662_vm1 = vcmp.eq.s32.totalorder %v1568_v43, %v4469_v28 }
 0x19a   : > { %3323 = vmatmul.mubr.msk.bf16.gmra.mxu1 %vm3322_vm4, %v4167_v47  ;;  %vm1650_vm4 = vcmp.eq.s32.totalorder %v1565_v40, %v4469_v28 }
 0x19b   : > { %3325 = vmatprep.mubr.msk.bf16.mxu1 %vm3324_vm7, %v4167_v47  ;;  %vm1643_vm7 = vcmp.eq.s32.totalorder %v1563_v37, %v4555_v25  ;;  %vm3268_vm9 = vmpackc.low %vm1654_vm5, %vm1650_vm4  ;;  %vm1655_vm4 = vcmp.eq.s32.totalorder %v1566_v41, %v4555_v25 }
 0x19c   : > { %vm3330_vm12 = vmpackc.low %vm1647_vm8, %vm1643_vm7  ;;  %vm1664_vm7 = vcmp.eq.s32.totalorder %v1568_v43, %v4479_v38 }
 0x19e   : > { %3263 = vmatmul.mubr.msk.bf16.gmra.mxu0 %vm3262_vm10, %v4167_v47  ;;  %vm1652_vm10 = vcmp.eq.s32.totalorder %v1565_v40, %v4479_v38 }
 0x19f   : > { %3265 = vmatprep.mubr.msk.bf16.mxu0 %vm3264_vm13, %v4167_v47  ;;  %vm1649_vm13 = vcmp.eq.s32.totalorder %v1565_v40, %v4545_v11  ;;  %vm3332_vm15 = vmpackc.low %vm1656_vm11, %vm1652_vm10  ;;  %vm1661_vm10 = vcmp.eq.s32.totalorder %v1568_v43, %v4545_v11 }
 0x1a0   : > { %vm3270_vm2 = vmpackc.low %vm1653_vm14, %vm1649_vm13  ;;  %vm1670_vm13 = vcmp.eq.s32.totalorder %v1570_v45, %v4469_v28 }
 0x1a2   : > { %3327 = vmatmul.mubr.msk.bf16.gmra.mxu1 %vm3326_vm0, %v4167_v47  ;;  %vm1658_vm0 = vcmp.eq.s32.totalorder %v1567_v42, %v4469_v28 }
 0x1a3   : > { %3329 = vmatprep.mubr.msk.bf16.mxu1 %vm3328_vm3, %v4167_v47  ;;  %vm1651_vm3 = vcmp.eq.s32.totalorder %v1565_v40, %v4555_v25  ;;  %vm3272_vm5 = vmpackc.low %vm1662_vm1, %vm1658_vm0  ;;  %vm1663_vm0 = vcmp.eq.s32.totalorder %v1568_v43, %v4555_v25  ;;  %v2053_v40 = vld [vmem:[#allocation2 + $0x50] sm:$0xff] }
 0x1a4   : > { %vm3334_vm8 = vmpackc.low %vm1655_vm4, %vm1651_vm3  ;;  %vm1672_vm3 = vcmp.eq.s32.totalorder %v1570_v45, %v4479_v38 }
 0x1a6   : > { %3267 = vmatmul.mubr.msk.bf16.gmra.mxu0 %vm3266_vm6, %v4167_v47  ;;  %vm1660_vm6 = vcmp.eq.s32.totalorder %v1567_v42, %v4479_v38 }
 0x1a7   : > { %3269 = vmatprep.mubr.msk.bf16.mxu0 %vm3268_vm9, %v4167_v47  ;;  %vm1657_vm9 = vcmp.eq.s32.totalorder %v1567_v42, %v4545_v11  ;;  %vm3336_vm11 = vmpackc.low %vm1664_vm7, %vm1660_vm6  ;;  %vm1669_vm6 = vcmp.eq.s32.totalorder %v1570_v45, %v4545_v11 }
 0x1a8   : > { %vm3274_vm14 = vmpackc.low %vm1661_vm10, %vm1657_vm9  ;;  %vm1678_vm9 = vcmp.eq.s32.totalorder %v1572_v48, %v4469_v28 }
 0x1aa   : > { %3331 = vmatmul.mubr.msk.bf16.gmra.mxu1 %vm3330_vm12, %v4167_v47  ;;  %vm1666_vm12 = vcmp.eq.s32.totalorder %v1569_v44, %v4469_v28 }
 0x1ab   : > { %3333 = vmatprep.mubr.msk.bf16.mxu1 %vm3332_vm15, %v4167_v47  ;;  %vm1659_vm15 = vcmp.eq.s32.totalorder %v1567_v42, %v4555_v25  ;;  %vm3276_vm1 = vmpackc.low %vm1670_vm13, %vm1666_vm12  ;;  %vm1671_vm12 = vcmp.eq.s32.totalorder %v1570_v45, %v4555_v25 }
 0x1ac   : > { %vm3338_vm4 = vmpackc.low %vm1663_vm0, %vm1659_vm15  ;;  %vm1680_vm15 = vcmp.eq.s32.totalorder %v1572_v48, %v4479_v38 }
 0x1ae   : > { %3271 = vmatmul.mubr.msk.bf16.gmra.mxu0 %vm3270_vm2, %v4167_v47  ;;  %vm1668_vm2 = vcmp.eq.s32.totalorder %v1569_v44, %v4479_v38 }
 0x1af   : > { %3273 = vmatprep.mubr.msk.bf16.mxu0 %vm3272_vm5, %v4167_v47  ;;  %vm1665_vm5 = vcmp.eq.s32.totalorder %v1569_v44, %v4545_v11  ;;  %vm3340_vm7 = vmpackc.low %vm1672_vm3, %vm1668_vm2  ;;  %vm1677_vm2 = vcmp.eq.s32.totalorder %v1572_v48, %v4545_v11 }
 0x1b0   : > { %vm3278_vm10 = vmpackc.low %vm1669_vm6, %vm1665_vm5  ;;  %vm1686_vm5 = vcmp.eq.s32.totalorder %v1574_v50, %v4469_v28 }
 0x1b2   : > { %3335 = vmatmul.mubr.msk.bf16.gmra.mxu1 %vm3334_vm8, %v4167_v47  ;;  %vm1674_vm8 = vcmp.eq.s32.totalorder %v1571_v46, %v4469_v28 }
 0x1b3   : > { %3337 = vmatprep.mubr.msk.bf16.mxu1 %vm3336_vm11, %v4167_v47  ;;  %vm1667_vm11 = vcmp.eq.s32.totalorder %v1569_v44, %v4555_v25  ;;  %vm3280_vm13 = vmpackc.low %vm1678_vm9, %vm1674_vm8  ;;  %vm1679_vm8 = vcmp.eq.s32.totalorder %v1572_v48, %v4555_v25 }
 0x1b4   : > { %vm3342_vm0 = vmpackc.low %vm1671_vm12, %vm1667_vm11  ;;  %vm1688_vm11 = vcmp.eq.s32.totalorder %v1574_v50, %v4479_v38 }
 0x1b6   : > { %3275 = vmatmul.mubr.msk.bf16.gmra.mxu0 %vm3274_vm14, %v4167_v47  ;;  %vm1676_vm14 = vcmp.eq.s32.totalorder %v1571_v46, %v4479_v38 }
 0x1b7   : > { %3277 = vmatprep.mubr.msk.bf16.mxu0 %vm3276_vm1, %v4167_v47  ;;  %vm1673_vm1 = vcmp.eq.s32.totalorder %v1571_v46, %v4545_v11  ;;  %vm3344_vm3 = vmpackc.low %vm1680_vm15, %vm1676_vm14  ;;  %vm1685_vm14 = vcmp.eq.s32.totalorder %v1574_v50, %v4545_v11 }
 0x1b8   : > { %vm3282_vm6 = vmpackc.low %vm1677_vm2, %vm1673_vm1  ;;  %vm1694_vm1 = vcmp.eq.s32.totalorder %v1576_v52, %v4469_v28 }
 0x1ba   : > { %3339 = vmatmul.mubr.msk.bf16.gmra.mxu1 %vm3338_vm4, %v4167_v47  ;;  %vm1682_vm4 = vcmp.eq.s32.totalorder %v1573_v49, %v4469_v28 }
 0x1bb   : > { %3341 = vmatprep.mubr.msk.bf16.mxu1 %vm3340_vm7, %v4167_v47  ;;  %vm1675_vm7 = vcmp.eq.s32.totalorder %v1571_v46, %v4555_v25  ;;  %vm3284_vm9 = vmpackc.low %vm1686_vm5, %vm1682_vm4  ;;  %vm1687_vm4 = vcmp.eq.s32.totalorder %v1574_v50, %v4555_v25  ;;  %v2054_v50 = vld [vmem:[#allocation2 + $0x68] sm:$0xff] }
 0x1bc   : > { %vm3346_vm12 = vmpackc.low %vm1679_vm8, %vm1675_vm7  ;;  %vm1696_vm7 = vcmp.eq.s32.totalorder %v1576_v52, %v4479_v38 }
 0x1be   : > { %3279 = vmatmul.mubr.msk.bf16.gmra.mxu0 %vm3278_vm10, %v4167_v47  ;;  %vm1684_vm10 = vcmp.eq.s32.totalorder %v1573_v49, %v4479_v38 }
 0x1bf   : > { %3281 = vmatprep.mubr.msk.bf16.mxu0 %vm3280_vm13, %v4167_v47  ;;  %vm1681_vm13 = vcmp.eq.s32.totalorder %v1573_v49, %v4545_v11  ;;  %vm3348_vm15 = vmpackc.low %vm1688_vm11, %vm1684_vm10  ;;  %vm1693_vm10 = vcmp.eq.s32.totalorder %v1576_v52, %v4545_v11 }
 0x1c0   : > { %vm3286_vm2 = vmpackc.low %vm1685_vm14, %vm1681_vm13  ;;  %vm1702_vm13 = vcmp.eq.s32.totalorder %v1578_v54, %v4469_v28 }
 0x1c2   : > { %3343 = vmatmul.mubr.msk.bf16.gmra.mxu1 %vm3342_vm0, %v4167_v47  ;;  %vm1690_vm0 = vcmp.eq.s32.totalorder %v1575_v51, %v4469_v28 }
 0x1c3   : > { %3345 = vmatprep.mubr.msk.bf16.mxu1 %vm3344_vm3, %v4167_v47  ;;  %vm1683_vm3 = vcmp.eq.s32.totalorder %v1573_v49, %v4555_v25  ;;  %vm3288_vm5 = vmpackc.low %vm1694_vm1, %vm1690_vm0  ;;  %vm1695_vm0 = vcmp.eq.s32.totalorder %v1576_v52, %v4555_v25 }
 0x1c4   : > { %vm3350_vm8 = vmpackc.low %vm1687_vm4, %vm1683_vm3  ;;  %vm1704_vm3 = vcmp.eq.s32.totalorder %v1578_v54, %v4479_v38 }
 0x1c6   : > { %3283 = vmatmul.mubr.msk.bf16.gmra.mxu0 %vm3282_vm6, %v4167_v47  ;;  %vm1692_vm6 = vcmp.eq.s32.totalorder %v1575_v51, %v4479_v38 }
 0x1c7   : > { %3285 = vmatprep.mubr.msk.bf16.mxu0 %vm3284_vm9, %v4167_v47  ;;  %vm1689_vm9 = vcmp.eq.s32.totalorder %v1575_v51, %v4545_v11  ;;  %vm3352_vm11 = vmpackc.low %vm1696_vm7, %vm1692_vm6  ;;  %vm1701_vm6 = vcmp.eq.s32.totalorder %v1578_v54, %v4545_v11 }
 0x1c8   : > { %vm3290_vm14 = vmpackc.low %vm1693_vm10, %vm1689_vm9  ;;  %vm1710_vm9 = vcmp.eq.s32.totalorder %v1580_v56, %v4469_v28 }
 0x1ca   : > { %3347 = vmatmul.mubr.msk.bf16.gmra.mxu1 %vm3346_vm12, %v4167_v47  ;;  %vm1698_vm12 = vcmp.eq.s32.totalorder %v1577_v53, %v4469_v28 }
 0x1cb   : > { %3349 = vmatprep.mubr.msk.bf16.mxu1 %vm3348_vm15, %v4167_v47  ;;  %vm1691_vm15 = vcmp.eq.s32.totalorder %v1575_v51, %v4555_v25  ;;  %vm3292_vm1 = vmpackc.low %vm1702_vm13, %vm1698_vm12  ;;  %vm1703_vm12 = vcmp.eq.s32.totalorder %v1578_v54, %v4555_v25 }
 0x1cc   : > { %vm3354_vm4 = vmpackc.low %vm1695_vm0, %vm1691_vm15  ;;  %vm1712_vm15 = vcmp.eq.s32.totalorder %v1580_v56, %v4479_v38 }
 0x1ce   : > { %3287 = vmatmul.mubr.msk.bf16.gmra.mxu0 %vm3286_vm2, %v4167_v47  ;;  %vm1700_vm2 = vcmp.eq.s32.totalorder %v1577_v53, %v4479_v38 }
 0x1cf   : > { %3289 = vmatprep.mubr.msk.bf16.mxu0 %vm3288_vm5, %v4167_v47  ;;  %vm1697_vm5 = vcmp.eq.s32.totalorder %v1577_v53, %v4545_v11  ;;  %vm3356_vm7 = vmpackc.low %vm1704_vm3, %vm1700_vm2  ;;  %vm1709_vm2 = vcmp.eq.s32.totalorder %v1580_v56, %v4545_v11 }
 0x1d0   : > { %vm3294_vm10 = vmpackc.low %vm1701_vm6, %vm1697_vm5  ;;  %vm1718_vm5 = vcmp.eq.s32.totalorder %v1582_v58, %v4469_v28 }
 0x1d2   : > { %3351 = vmatmul.mubr.msk.bf16.gmra.mxu1 %vm3350_vm8, %v4167_v47  ;;  %vm1706_vm8 = vcmp.eq.s32.totalorder %v1579_v55, %v4469_v28 }
 0x1d3   : > { %3353 = vmatprep.mubr.msk.bf16.mxu1 %vm3352_vm11, %v4167_v47  ;;  %vm1699_vm11 = vcmp.eq.s32.totalorder %v1577_v53, %v4555_v25  ;;  %vm3296_vm13 = vmpackc.low %vm1710_vm9, %vm1706_vm8  ;;  %vm1711_vm8 = vcmp.eq.s32.totalorder %v1580_v56, %v4555_v25 }
 0x1d4   : > { %vm3358_vm0 = vmpackc.low %vm1703_vm12, %vm1699_vm11  ;;  %vm1720_vm11 = vcmp.eq.s32.totalorder %v1582_v58, %v4479_v38 }
 0x1d6   : > { %3291 = vmatmul.mubr.msk.bf16.gmra.mxu0 %vm3290_vm14, %v4167_v47  ;;  %vm1708_vm14 = vcmp.eq.s32.totalorder %v1579_v55, %v4479_v38 }
 0x1d7   : > { %3293 = vmatprep.mubr.msk.bf16.mxu0 %vm3292_vm1, %v4167_v47  ;;  %vm1705_vm1 = vcmp.eq.s32.totalorder %v1579_v55, %v4545_v11  ;;  %vm3360_vm3 = vmpackc.low %vm1712_vm15, %vm1708_vm14  ;;  %vm1717_vm14 = vcmp.eq.s32.totalorder %v1582_v58, %v4545_v11 }
 0x1d8   : > { %vm3298_vm6 = vmpackc.low %vm1709_vm2, %vm1705_vm1  ;;  %vm1726_vm1 = vcmp.eq.s32.totalorder %v1584_v60, %v4469_v28 }
 0x1da   : > { %3355 = vmatmul.mubr.msk.bf16.gmra.mxu1 %vm3354_vm4, %v4167_v47  ;;  %vm1714_vm4 = vcmp.eq.s32.totalorder %v1581_v57, %v4469_v28 }
 0x1db   : > { %3357 = vmatprep.mubr.msk.bf16.mxu1 %vm3356_vm7, %v4167_v47  ;;  %vm1707_vm7 = vcmp.eq.s32.totalorder %v1579_v55, %v4555_v25  ;;  %vm3300_vm9 = vmpackc.low %vm1718_vm5, %vm1714_vm4  ;;  %vm1719_vm4 = vcmp.eq.s32.totalorder %v1582_v58, %v4555_v25 }
 0x1dc   : > { %vm3362_vm12 = vmpackc.low %vm1711_vm8, %vm1707_vm7  ;;  %vm1728_vm7 = vcmp.eq.s32.totalorder %v1584_v60, %v4479_v38 }
 0x1de   : > { %3295 = vmatmul.mubr.msk.bf16.gmra.mxu0 %vm3294_vm10, %v4167_v47  ;;  %vm1716_vm10 = vcmp.eq.s32.totalorder %v1581_v57, %v4479_v38 }
 0x1df   : > { %3297 = vmatprep.mubr.msk.bf16.mxu0 %vm3296_vm13, %v4167_v47  ;;  %vm1713_vm13 = vcmp.eq.s32.totalorder %v1581_v57, %v4545_v11  ;;  %vm3364_vm15 = vmpackc.low %vm1720_vm11, %vm1716_vm10  ;;  %vm1725_vm10 = vcmp.eq.s32.totalorder %v1584_v60, %v4545_v11 }
 0x1e0   : > { %vm3302_vm2 = vmpackc.low %vm1717_vm14, %vm1713_vm13  ;;  %vm1723_vm13 = vcmp.eq.s32.totalorder %v1583_v59, %v4555_v25  ;;  %vm1727_vm14 = vcmp.eq.s32.totalorder %v1584_v60, %v4555_v25 }
 0x1e2   : > { %3359 = vmatmul.mubr.msk.bf16.gmra.mxu1 %vm3358_vm0, %v4167_v47  ;;  %vm1722_vm0 = vcmp.eq.s32.totalorder %v1583_v59, %v4469_v28 }
 0x1e3   : > { %3361 = vmatprep.mubr.msk.bf16.mxu1 %vm3360_vm3, %v4167_v47  ;;  %vm1715_vm3 = vcmp.eq.s32.totalorder %v1581_v57, %v4555_v25  ;;  %vm3304_vm5 = vmpackc.low %vm1726_vm1, %vm1722_vm0 }
 0x1e4   : > { %vm3366_vm8 = vmpackc.low %vm1719_vm4, %vm1715_vm3 }
 0x1e6   : > { %3299 = vmatmul.mubr.msk.bf16.gmra.mxu0 %vm3298_vm6, %v4167_v47  ;;  %vm1724_vm6 = vcmp.eq.s32.totalorder %v1583_v59, %v4479_v38 }
 0x1e7   : > { %3301 = vmatprep.mubr.msk.bf16.mxu0 %vm3300_vm9, %v4167_v47  ;;  %vm1721_vm9 = vcmp.eq.s32.totalorder %v1583_v59, %v4545_v11  ;;  %vm3368_vm11 = vmpackc.low %vm1728_vm7, %vm1724_vm6  ;;  %v2050_v11 = vld [vmem:[#allocation2] sm:$0xff]  ;;  %v2055_v59 = vld [vmem:[#allocation2 + $0x30] sm:$0xff] }
 0x1ea   : > { %3363 = vmatmul.mubr.msk.bf16.gmra.mxu1 %vm3362_vm12, %v4167_v47  ;;  %vm3306_vm12 = vmpackc.low %vm1725_vm10, %vm1721_vm9 }
 0x1eb   : > { %3365 = vmatprep.mubr.msk.bf16.mxu1 %vm3364_vm15, %v4167_v47  ;;  %vm3370_vm15 = vmpackc.low %vm1727_vm14, %vm1723_vm13 }
 0x1ee   : > { %3303 = vmatmul.mubr.msk.bf16.gmra.mxu0 %vm3302_vm2, %v4167_v47 }
 0x1ef   : > { %3305 = vmatprep.mubr.msk.bf16.mxu0 %vm3304_vm5, %v4167_v47 }
 0x1f2   : > { %3367 = vmatmul.mubr.msk.bf16.gmra.mxu1 %vm3366_vm8, %v4167_v47 }
 0x1f3   : > { %3369 = vmatprep.mubr.msk.bf16.mxu1 %vm3368_vm11, %v4167_v47 }
 0x1f6   : > { %3307 = vmatmul.mubr.msk.bf16.gmra.mxu0 %vm3306_vm12, %v4167_v47 }
 0x1fa   : > { %3371 = vmatmul.mubr.msk.bf16.gmra.mxu1 %vm3370_vm15, %v4167_v47 }
 0x23e   : > { %v3714_v12 = vpop.f32.mrf.mxu0 }
 0x240   : > { %v3715_v28 = vpop.f32.mrf.mxu0 }
 0x241   : > { %v3716_v0 = vadd.f32 %v3715_v28, %v3714_v12 }
 0x242   : > { %v3717_v38 = vpop.f32.mrf.mxu0  ;;  %v3826_v61 = vpop.f32.mrf.mxu1 }
 0x244   : > { %v3718_v62 = vpop.f32.mrf.mxu0  ;;  %v3827_v63 = vpop.f32.mrf.mxu1 }
 0x245   : > { %v3828_v1 = vadd.f32 %v3827_v63, %v3826_v61  ;;  %v3719_v8 = vadd.f32 %v3718_v62, %v3717_v38 }
 0x246   : > { %v3720_v3 = vpop.f32.mrf.mxu0  ;;  %v3829_v4 = vpop.f32.mrf.mxu1 }
 0x247   : > { %v2309_v5 = vadd.f32 %v3828_v1, %v3716_v0  ;;  %v2056_v1 = vld [vmem:[#allocation2 + $0x48] sm:$0xff] }
 0x248   : > { %v3721_v6 = vpop.f32.mrf.mxu0  ;;  %v3830_v7 = vpop.f32.mrf.mxu1 }
 0x249   : > { %v2435_v9 = vadd.f32 %v2309_v5, %v2049_v2  ;;  %v3831_v10 = vadd.f32 %v3830_v7, %v3829_v4  ;;  %v3722_v18 = vadd.f32 %v3721_v6, %v3720_v3 }
 0x24a   : > { %v3723_v13 = vpop.f32.mrf.mxu0  ;;  %v3832_v47 = vpop.f32.mrf.mxu1 }
 0x24b   : > { %2467 = vst [vmem:[#allocation2 + $0xb0] sm:$0xff] %v2435_v9  ;;  %v2312_v14 = vadd.f32 %v3831_v10, %v3719_v8  ;;  %v2057_v10 = vld [vmem:[#allocation2 + $0x80] sm:$0xff] }
 0x24c   : > { %v3724_v15 = vpop.f32.mrf.mxu0  ;;  %v3833_v17 = vpop.f32.mrf.mxu1 }
 0x24d   : > { %v2436_v19 = vadd.f32 %v2312_v14, %v2050_v11  ;;  %v3834_v20 = vadd.f32 %v3833_v17, %v3832_v47  ;;  %v3725_v29 = vadd.f32 %v3724_v15, %v3723_v13 }
 0x24e   : > { %v3726_v23 = vpop.f32.mrf.mxu0  ;;  %v3835_v24 = vpop.f32.mrf.mxu1 }
 0x24f   : > { %2468 = vst [vmem:[#allocation2] sm:$0xff] %v2436_v19  ;;  %v2317_v25 = vadd.f32 %v3834_v20, %v3722_v18  ;;  %v2058_v20 = vld [vmem:[#allocation2 + $0x88] sm:$0xff] }
 0x250   : > { %v3727_v26 = vpop.f32.mrf.mxu0  ;;  %v3836_v27 = vpop.f32.mrf.mxu1 }
 0x251   : > { %v2437_v30 = vadd.f32 %v2317_v25, %v2051_v21  ;;  %v3837_v31 = vadd.f32 %v3836_v27, %v3835_v24  ;;  %v3728_v36 = vadd.f32 %v3727_v26, %v3726_v23 }
 0x252   : > { %v3729_v32 = vpop.f32.mrf.mxu0  ;;  %v3838_v33 = vpop.f32.mrf.mxu1 }
 0x253   : > { %2469 = vst [vmem:[#allocation2 + $0xd8] sm:$0xff] %v2437_v30  ;;  %v2320_v22 = vadd.f32 %v3837_v31, %v3725_v29  ;;  %v2059_v31 = vld [vmem:[#allocation2 + $0xe8] sm:$0xff] }
 0x254   : > { %v3730_v34 = vpop.f32.mrf.mxu0  ;;  %v3839_v35 = vpop.f32.mrf.mxu1 }
 0x255   : > { %v2438_v37 = vadd.f32 %v2320_v22, %v2052_v16  ;;  %v3840_v39 = vadd.f32 %v3839_v35, %v3838_v33  ;;  %v3731_v46 = vadd.f32 %v3730_v34, %v3729_v32 }
 0x256   : > { %v3732_v41 = vpop.f32.mrf.mxu0  ;;  %v3841_v42 = vpop.f32.mrf.mxu1 }
 0x257   : > { %2470 = vst [vmem:[#allocation2 + $0x18] sm:$0xff] %v2438_v37  ;;  %v2325_v43 = vadd.f32 %v3840_v39, %v3728_v36  ;;  %v2060_v39 = vld [vmem:[#allocation2 + $0xb8] sm:$0xff] }
 0x258   : > { %v3733_v44 = vpop.f32.mrf.mxu0  ;;  %v3842_v45 = vpop.f32.mrf.mxu1 }
 0x259   : > { %v2439_v48 = vadd.f32 %v2325_v43, %v2053_v40  ;;  %v3843_v49 = vadd.f32 %v3842_v45, %v3841_v42  ;;  %v3734_v56 = vadd.f32 %v3733_v44, %v3732_v41 }
 0x25a   : > { %v3735_v51 = vpop.f32.mrf.mxu0  ;;  %v3844_v52 = vpop.f32.mrf.mxu1 }
 0x25b   : > { %2471 = vst [vmem:[#allocation2 + $0x50] sm:$0xff] %v2439_v48  ;;  %v2328_v53 = vadd.f32 %v3843_v49, %v3731_v46  ;;  %v2061_v49 = vld [vmem:[#allocation2 + $0x60] sm:$0xff] }
 0x25c   : > { %v3736_v54 = vpop.f32.mrf.mxu0  ;;  %v3845_v55 = vpop.f32.mrf.mxu1 }
 0x25d   : > { %v2440_v57 = vadd.f32 %v2328_v53, %v2054_v50  ;;  %v3846_v58 = vadd.f32 %v3845_v55, %v3844_v52  ;;  %v3737_v62 = vadd.f32 %v3736_v54, %v3735_v51 }
 0x25e   : > { %v3738_v60 = vpop.f32.mrf.mxu0  ;;  %v3847_v12 = vpop.f32.mrf.mxu1 }
 0x25f   : > { %2472 = vst [vmem:[#allocation2 + $0x68] sm:$0xff] %v2440_v57  ;;  %v2333_v28 = vadd.f32 %v3846_v58, %v3734_v56  ;;  %v2062_v58 = vld [vmem:[#allocation2 + $0xf0] sm:$0xff] }
 0x260   : > { %v3739_v38 = vpop.f32.mrf.mxu0  ;;  %v3848_v61 = vpop.f32.mrf.mxu1 }
 0x261   : > { %v2441_v63 = vadd.f32 %v2333_v28, %v2055_v59  ;;  %v3849_v0 = vadd.f32 %v3848_v61, %v3847_v12  ;;  %v3740_v7 = vadd.f32 %v3739_v38, %v3738_v60 }
 0x262   : > { %v3741_v2 = vpop.f32.mrf.mxu0  ;;  %v3850_v3 = vpop.f32.mrf.mxu1 }
 0x263   : > { %2473 = vst [vmem:[#allocation2 + $0x30] sm:$0xff] %v2441_v63  ;;  %v2336_v4 = vadd.f32 %v3849_v0, %v3737_v62  ;;  %v2063_v0 = vld [vmem:[#allocation2 + $0x8] sm:$0xff] }
 0x264   : > { %v3742_v5 = vpop.f32.mrf.mxu0  ;;  %v3851_v6 = vpop.f32.mrf.mxu1 }
 0x265   : > { %v2442_v8 = vadd.f32 %v2336_v4, %v2056_v1  ;;  %v3852_v9 = vadd.f32 %v3851_v6, %v3850_v3  ;;  %v3743_v17 = vadd.f32 %v3742_v5, %v3741_v2 }
 0x266   : > { %v3744_v11 = vpop.f32.mrf.mxu0  ;;  %v3853_v13 = vpop.f32.mrf.mxu1 }
 0x267   : > { %2474 = vst [vmem:[#allocation2 + $0x48] sm:$0xff] %v2442_v8  ;;  %v2341_v47 = vadd.f32 %v3852_v9, %v3740_v7  ;;  %v2064_v9 = vld [vmem:[#allocation2 + $0x78] sm:$0xff] }
 0x268   : > { %v3745_v14 = vpop.f32.mrf.mxu0  ;;  %v3854_v15 = vpop.f32.mrf.mxu1 }
 0x269   : > { %v2443_v18 = vadd.f32 %v2341_v47, %v2057_v10  ;;  %v3855_v19 = vadd.f32 %v3854_v15, %v3853_v13  ;;  %v3746_v27 = vadd.f32 %v3745_v14, %v3744_v11 }
 0x26a   : > { %v3747_v21 = vpop.f32.mrf.mxu0  ;;  %v3856_v23 = vpop.f32.mrf.mxu1 }
 0x26b   : > { %2475 = vst [vmem:[#allocation2 + $0x80] sm:$0xff] %v2443_v18  ;;  %v2344_v24 = vadd.f32 %v3855_v19, %v3743_v17  ;;  %v2065_v19 = vld [vmem:[#allocation2 + $0x38] sm:$0xff] }
 0x26c   : > { %v3748_v25 = vpop.f32.mrf.mxu0  ;;  %v3857_v26 = vpop.f32.mrf.mxu1 }
 0x26d   : > { %v2444_v29 = vadd.f32 %v2344_v24, %v2058_v20  ;;  %v3858_v30 = vadd.f32 %v3857_v26, %v3856_v23  ;;  %v3749_v35 = vadd.f32 %v3748_v25, %v3747_v21 }
 0x26e   : > { %v3750_v16 = vpop.f32.mrf.mxu0  ;;  %v3859_v32 = vpop.f32.mrf.mxu1 }
 0x26f   : > { %2476 = vst [vmem:[#allocation2 + $0x88] sm:$0xff] %v2444_v29  ;;  %v2349_v33 = vadd.f32 %v3858_v30, %v3746_v27  ;;  %v2066_v30 = vld [vmem:[#allocation2 + $0x58] sm:$0xff] }
 0x270   : > { %v3751_v22 = vpop.f32.mrf.mxu0  ;;  %v3860_v34 = vpop.f32.mrf.mxu1 }
 0x271   : > { %v2445_v36 = vadd.f32 %v2349_v33, %v2059_v31  ;;  %v3861_v37 = vadd.f32 %v3860_v34, %v3859_v32  ;;  %v3752_v45 = vadd.f32 %v3751_v22, %v3750_v16 }
 0x272   : > { %v3753_v40 = vpop.f32.mrf.mxu0  ;;  %v3862_v41 = vpop.f32.mrf.mxu1 }
 0x273   : > { %2477 = vst [vmem:[#allocation2 + $0xe8] sm:$0xff] %v2445_v36  ;;  %v2352_v42 = vadd.f32 %v3861_v37, %v3749_v35  ;;  %v2067_v37 = vld [vmem:[#allocation2 + $0x40] sm:$0xff] }
 0x274   : > { %v3754_v43 = vpop.f32.mrf.mxu0  ;;  %v3863_v44 = vpop.f32.mrf.mxu1 }
 0x275   : > { %v2446_v46 = vadd.f32 %v2352_v42, %v2060_v39  ;;  %v3864_v48 = vadd.f32 %v3863_v44, %v3862_v41  ;;  %v3755_v55 = vadd.f32 %v3754_v43, %v3753_v40 }
 0x276   : > { %v3756_v50 = vpop.f32.mrf.mxu0  ;;  %v3865_v51 = vpop.f32.mrf.mxu1 }
 0x277   : > { %2478 = vst [vmem:[#allocation2 + $0xb8] sm:$0xff] %v2446_v46  ;;  %v2357_v52 = vadd.f32 %v3864_v48, %v3752_v45  ;;  %v2068_v48 = vld [vmem:[#allocation2 + $0xc8] sm:$0xff] }
 0x278   : > { %v3757_v53 = vpop.f32.mrf.mxu0  ;;  %v3866_v54 = vpop.f32.mrf.mxu1 }
 0x279   : > { %v2447_v56 = vadd.f32 %v2357_v52, %v2061_v49  ;;  %v3867_v57 = vadd.f32 %v3866_v54, %v3865_v51  ;;  %v3758_v61 = vadd.f32 %v3757_v53, %v3756_v50 }
 0x27a   : > { %v3759_v59 = vpop.f32.mrf.mxu0  ;;  %v3868_v60 = vpop.f32.mrf.mxu1 }
 0x27b   : > { %2479 = vst [vmem:[#allocation2 + $0x60] sm:$0xff] %v2447_v56  ;;  %v2360_v12 = vadd.f32 %v3867_v57, %v3755_v55  ;;  %v2069_v57 = vld [vmem:[#allocation2 + $0xe0] sm:$0xff] }
 0x27c   : > { %v3760_v28 = vpop.f32.mrf.mxu0  ;;  %v3869_v38 = vpop.f32.mrf.mxu1 }
 0x27d   : > { %v2448_v62 = vadd.f32 %v2360_v12, %v2062_v58  ;;  %v3870_v63 = vadd.f32 %v3869_v38, %v3868_v60  ;;  %v3761_v6 = vadd.f32 %v3760_v28, %v3759_v59 }
 0x27e   : > { %v3762_v1 = vpop.f32.mrf.mxu0  ;;  %v3871_v2 = vpop.f32.mrf.mxu1 }
 0x27f   : > { %2480 = vst [vmem:[#allocation2 + $0xf0] sm:$0xff] %v2448_v62  ;;  %v2365_v3 = vadd.f32 %v3870_v63, %v3758_v61  ;;  %v2070_v63 = vld [vmem:[#allocation2 + $0x90] sm:$0xff] }
 0x280   : > { %v3763_v4 = vpop.f32.mrf.mxu0  ;;  %v3872_v5 = vpop.f32.mrf.mxu1 }
 0x281   : > { %v2449_v7 = vadd.f32 %v2365_v3, %v2063_v0  ;;  %v3873_v8 = vadd.f32 %v3872_v5, %v3871_v2  ;;  %v3764_v15 = vadd.f32 %v3763_v4, %v3762_v1 }
 0x282   : > { %v3765_v10 = vpop.f32.mrf.mxu0  ;;  %v3874_v11 = vpop.f32.mrf.mxu1 }
 0x283   : > { %2481 = vst [vmem:[#allocation2 + $0x8] sm:$0xff] %v2449_v7  ;;  %v2368_v13 = vadd.f32 %v3873_v8, %v3761_v6  ;;  %v2071_v8 = vld [vmem:[#allocation2 + $0x70] sm:$0xff] }
 0x284   : > { %v3766_v47 = vpop.f32.mrf.mxu0  ;;  %v3875_v14 = vpop.f32.mrf.mxu1 }
 0x285   : > { %v2450_v17 = vadd.f32 %v2368_v13, %v2064_v9  ;;  %v3876_v18 = vadd.f32 %v3875_v14, %v3874_v11  ;;  %v3767_v26 = vadd.f32 %v3766_v47, %v3765_v10 }
 0x286   : > { %v3768_v20 = vpop.f32.mrf.mxu0  ;;  %v3877_v21 = vpop.f32.mrf.mxu1 }
 0x287   : > { %2482 = vst [vmem:[#allocation2 + $0x78] sm:$0xff] %v2450_v17  ;;  %v2373_v23 = vadd.f32 %v3876_v18, %v3764_v15  ;;  %v2072_v18 = vld [vmem:[#allocation2 + $0xc0] sm:$0xff] }
 0x288   : > { %v3769_v24 = vpop.f32.mrf.mxu0  ;;  %v3878_v25 = vpop.f32.mrf.mxu1 }
 0x289   : > { %v2451_v27 = vadd.f32 %v2373_v23, %v2065_v19  ;;  %v3879_v29 = vadd.f32 %v3878_v25, %v3877_v21  ;;  %v3770_v34 = vadd.f32 %v3769_v24, %v3768_v20 }
 0x28a   : > { %v3771_v31 = vpop.f32.mrf.mxu0  ;;  %v3880_v16 = vpop.f32.mrf.mxu1 }
 0x28b   : > { %2483 = vst [vmem:[#allocation2 + $0x38] sm:$0xff] %v2451_v27  ;;  %v2376_v32 = vadd.f32 %v3879_v29, %v3767_v26  ;;  %v2073_v29 = vld [vmem:[#allocation2 + $0xa8] sm:$0xff] }
 0x28c   : > { %v3772_v33 = vpop.f32.mrf.mxu0  ;;  %v3881_v22 = vpop.f32.mrf.mxu1 }
 0x28d   : > { %v2452_v35 = vadd.f32 %v2376_v32, %v2066_v30  ;;  %v3882_v36 = vadd.f32 %v3881_v22, %v3880_v16  ;;  %v3773_v44 = vadd.f32 %v3772_v33, %v3771_v31 }
 0x28e   : > { %v3774_v39 = vpop.f32.mrf.mxu0  ;;  %v3883_v40 = vpop.f32.mrf.mxu1 }
 0x28f   : > { %2484 = vst [vmem:[#allocation2 + $0x58] sm:$0xff] %v2452_v35  ;;  %v2381_v41 = vadd.f32 %v3882_v36, %v3770_v34  ;;  %v2074_v36 = vld [vmem:[#allocation2 + $0xd0] sm:$0xff] }
 0x290   : > { %v3775_v42 = vpop.f32.mrf.mxu0  ;;  %v3884_v43 = vpop.f32.mrf.mxu1 }
 0x291   : > { %v2453_v45 = vadd.f32 %v2381_v41, %v2067_v37  ;;  %v3885_v46 = vadd.f32 %v3884_v43, %v3883_v40  ;;  %v3776_v54 = vadd.f32 %v3775_v42, %v3774_v39 }
 0x292   : > { %v3777_v49 = vpop.f32.mrf.mxu0  ;;  %v3886_v50 = vpop.f32.mrf.mxu1 }
 0x293   : > { %2485 = vst [vmem:[#allocation2 + $0x40] sm:$0xff] %v2453_v45  ;;  %v2384_v51 = vadd.f32 %v3885_v46, %v3773_v44  ;;  %v2075_v46 = vld [vmem:[#allocation2 + $0x10] sm:$0xff] }
 0x294   : > { %v3778_v52 = vpop.f32.mrf.mxu0  ;;  %v3887_v53 = vpop.f32.mrf.mxu1 }
 0x295   : > { %v2454_v55 = vadd.f32 %v2384_v51, %v2068_v48  ;;  %v3888_v56 = vadd.f32 %v3887_v53, %v3886_v50  ;;  %v3779_v38 = vadd.f32 %v3778_v52, %v3777_v49 }
 0x296   : > { %v3780_v58 = vpop.f32.mrf.mxu0  ;;  %v3889_v59 = vpop.f32.mrf.mxu1 }
 0x297   : > { %2486 = vst [vmem:[#allocation2 + $0xc8] sm:$0xff] %v2454_v55  ;;  %v2389_v60 = vadd.f32 %v3888_v56, %v3776_v54  ;;  %v2076_v56 = vld [vmem:[#allocation2 + $0x28] sm:$0xff] }
 0x298   : > { %v3781_v12 = vpop.f32.mrf.mxu0  ;;  %v3890_v28 = vpop.f32.mrf.mxu1 }
 0x299   : > { %v2455_v61 = vadd.f32 %v2389_v60, %v2069_v57  ;;  %v3891_v62 = vadd.f32 %v3890_v28, %v3889_v59  ;;  %v3782_v5 = vadd.f32 %v3781_v12, %v3780_v58 }
 0x29a   : > { %v3783_v0 = vpop.f32.mrf.mxu0  ;;  %v3892_v1 = vpop.f32.mrf.mxu1 }
 0x29b   : > { %2487 = vst [vmem:[#allocation2 + $0xe0] sm:$0xff] %v2455_v61  ;;  %v2392_v2 = vadd.f32 %v3891_v62, %v3779_v38  ;;  %v2077_v62 = vld [vmem:[#allocation2 + $0xa0] sm:$0xff] }
 0x29c   : > { %v3784_v3 = vpop.f32.mrf.mxu0  ;;  %v3893_v4 = vpop.f32.mrf.mxu1 }
 0x29d   : > { %v2456_v6 = vadd.f32 %v2392_v2, %v2070_v63  ;;  %v3894_v7 = vadd.f32 %v3893_v4, %v3892_v1  ;;  %v3785_v14 = vadd.f32 %v3784_v3, %v3783_v0 }
 0x29e   : > { %v3786_v9 = vpop.f32.mrf.mxu0  ;;  %v3895_v10 = vpop.f32.mrf.mxu1 }
 0x29f   : > { %2488 = vst [vmem:[#allocation2 + $0x90] sm:$0xff] %v2456_v6  ;;  %v2397_v11 = vadd.f32 %v3894_v7, %v3782_v5  ;;  %v2078_v7 = vld [vmem:[#allocation2 + $0xf8] sm:$0xff] }
 0x2a0   : > { %v3787_v13 = vpop.f32.mrf.mxu0  ;;  %v3896_v47 = vpop.f32.mrf.mxu1 }
 0x2a1   : > { %v2457_v15 = vadd.f32 %v2397_v11, %v2071_v8  ;;  %v3897_v17 = vadd.f32 %v3896_v47, %v3895_v10  ;;  %v3788_v25 = vadd.f32 %v3787_v13, %v3786_v9 }
 0x2a2   : > { %v3789_v19 = vpop.f32.mrf.mxu0  ;;  %v3898_v20 = vpop.f32.mrf.mxu1 }
 0x2a3   : > { %2489 = vst [vmem:[#allocation2 + $0x70] sm:$0xff] %v2457_v15  ;;  %v2400_v21 = vadd.f32 %v3897_v17, %v3785_v14  ;;  %v2079_v17 = vld [vmem:[#allocation2 + $0x20] sm:$0xff] }
 0x2a4   : > { %v3790_v23 = vpop.f32.mrf.mxu0  ;;  %v3899_v24 = vpop.f32.mrf.mxu1 }
 0x2a5   : > { %v2458_v26 = vadd.f32 %v2400_v21, %v2072_v18  ;;  %v3900_v27 = vadd.f32 %v3899_v24, %v3898_v20  ;;  %v3791_v22 = vadd.f32 %v3790_v23, %v3789_v19 }
 0x2a6   : > { %v3792_v30 = vpop.f32.mrf.mxu0  ;;  %v3901_v31 = vpop.f32.mrf.mxu1 }
 0x2a7   : > { %2490 = vst [vmem:[#allocation2 + $0xc0] sm:$0xff] %v2458_v26  ;;  %v2405_v16 = vadd.f32 %v3900_v27, %v3788_v25  ;;  %v2080_v25 = vld [vmem:[#allocation2 + $0x98] sm:$0xff] }
 0x2a8   : > { %v3793_v32 = vpop.f32.mrf.mxu0  ;;  %v3902_v33 = vpop.f32.mrf.mxu1 }
 0x2a9   : > { %v2459_v34 = vadd.f32 %v2405_v16, %v2073_v29  ;;  %v3903_v35 = vadd.f32 %v3902_v33, %v3901_v31  ;;  %v3794_v43 = vadd.f32 %v3793_v32, %v3792_v30 }
 0x2aa   : > { %v3795_v37 = vpop.f32.mrf.mxu0  ;;  %v3904_v39 = vpop.f32.mrf.mxu1 }
 0x2ab   : > { %2491 = vst [vmem:[#allocation2 + $0xa8] sm:$0xff] %v2459_v34  ;;  %v2408_v40 = vadd.f32 %v3903_v35, %v3791_v22 }
 0x2ac   : > { %v3796_v41 = vpop.f32.mrf.mxu0  ;;  %v3905_v42 = vpop.f32.mrf.mxu1 }
 0x2ad   : > { %v2460_v44 = vadd.f32 %v2408_v40, %v2074_v36  ;;  %v3906_v45 = vadd.f32 %v3905_v42, %v3904_v39  ;;  %v3797_v53 = vadd.f32 %v3796_v41, %v3795_v37 }
 0x2ae   : > { %v3798_v48 = vpop.f32.mrf.mxu0  ;;  %v3907_v49 = vpop.f32.mrf.mxu1 }
 0x2af   : > { %2492 = vst [vmem:[#allocation2 + $0xd0] sm:$0xff] %v2460_v44  ;;  %v2413_v50 = vadd.f32 %v3906_v45, %v3794_v43 }
 0x2b0   : > { %v3799_v51 = vpop.f32.mrf.mxu0  ;;  %v3908_v52 = vpop.f32.mrf.mxu1 }
 0x2b1   : > { %v2461_v54 = vadd.f32 %v2413_v50, %v2075_v46  ;;  %v3909_v55 = vadd.f32 %v3908_v52, %v3907_v49  ;;  %v3800_v28 = vadd.f32 %v3799_v51, %v3798_v48 }
 0x2b2   : > { %v3801_v57 = vpop.f32.mrf.mxu0  ;;  %v3910_v58 = vpop.f32.mrf.mxu1 }
 0x2b3   : > { %2493 = vst [vmem:[#allocation2 + $0x10] sm:$0xff] %v2461_v54  ;;  %v2416_v59 = vadd.f32 %v3909_v55, %v3797_v53 }
 0x2b4   : > { %v3802_v60 = vpop.f32.mrf.mxu0  ;;  %v3911_v12 = vpop.f32.mrf.mxu1 }
 0x2b5   : > { %v2462_v38 = vadd.f32 %v2416_v59, %v2076_v56  ;;  %v3912_v61 = vadd.f32 %v3911_v12, %v3910_v58  ;;  %v3803_v4 = vadd.f32 %v3802_v60, %v3801_v57 }
 0x2b6   : > { %v3804_v63 = vpop.f32.mrf.mxu0  ;;  %v3913_v0 = vpop.f32.mrf.mxu1 }
 0x2b7   : > { %2494 = vst [vmem:[#allocation2 + $0x28] sm:$0xff] %v2462_v38  ;;  %v2421_v1 = vadd.f32 %v3912_v61, %v3800_v28 }
 0x2b8   : > { %v3805_v2 = vpop.f32.mrf.mxu0  ;;  %v3914_v3 = vpop.f32.mrf.mxu1 }
 0x2b9   : > { %v2463_v5 = vadd.f32 %v2421_v1, %v2077_v62  ;;  %v3915_v6 = vadd.f32 %v3914_v3, %v3913_v0  ;;  %v3806_v13 = vadd.f32 %v3805_v2, %v3804_v63 }
 0x2ba   : > { %v3807_v8 = vpop.f32.mrf.mxu0  ;;  %v3916_v9 = vpop.f32.mrf.mxu1 }
 0x2bb   : > { %2495 = vst [vmem:[#allocation2 + $0xa0] sm:$0xff] %v2463_v5  ;;  %v2424_v10 = vadd.f32 %v3915_v6, %v3803_v4 }
 0x2bc   : > { %v3917_v11 = vpop.f32.mrf.mxu1  ;;  %v3808_v15 = vpop.f32.mrf.mxu0 }
 0x2bd   : > { %v2464_v47 = vadd.f32 %v2424_v10, %v2078_v7  ;;  %v3918_v14 = vadd.f32 %v3917_v11, %v3916_v9  ;;  %v3809_v21 = vadd.f32 %v3808_v15, %v3807_v8 }
 0x2be   : > { %v3919_v18 = vpop.f32.mrf.mxu1 }
 0x2bf   : > { %2496 = vst [vmem:[#allocation2 + $0xf8] sm:$0xff] %v2464_v47  ;;  %v2429_v19 = vadd.f32 %v3918_v14, %v3806_v13 }
 0x2c0   : > { %v3920_v20 = vpop.f32.mrf.mxu1 }
 0x2c1   : > { %v2465_v23 = vadd.f32 %v2429_v19, %v2079_v17  ;;  %v3921_v24 = vadd.f32 %v3920_v20, %v3919_v18 }
 0x2c3   : > { %2497 = vst [vmem:[#allocation2 + $0x20] sm:$0xff] %v2465_v23  ;;  %v2432_v26 = vadd.f32 %v3921_v24, %v3809_v21 }
 0x2c5   : > { %v2466_v27 = vadd.f32 %v2432_v26, %v2080_v25 }
 0x2c7   : > { %2498 = vst [vmem:[#allocation2 + $0x98] sm:$0xff] %v2466_v27 }
 0x2c8 PF: > { %p3372_p2 = scmp.ne.s32.totalorder %s4144_s19, 1 }
 0x2ca   : > { %2502 = sbr.rel (%p3372_p2) target bundleno = 910 (0x38e), region = 64 }
 0x2cf   : > { %v2608_v29 = vld [vmem:[%s4376_s21 + $0x10] sm:$0xff]  ;;  %v2606_v30 = vld [vmem:[%s4376_s21] sm:$0xff]  ;;  %v4168_v31 = vmov 0   ;;  %v2609_v16 = vld [vmem:[%s4376_s21 + $0x18] sm:$0xff] }
 0x2d0   : > { %4015 = vset.pattern.permute.xlu1 %v4168_v31  ;;  %4014 = vset.pattern.permute.xlu0 %v4168_v31  ;;  %v2607_v32 = vld [vmem:[%s4376_s21 + $0x8] sm:$0xff]  ;;  %v2610_v22 = vld [vmem:[%s4376_s21 + $0x20] sm:$0xff]  ;;  %v2613_v34 = vld [vmem:[%s4376_s21 + $0x38] sm:$0xff] }
 0x2d1   : > { %2650 = vperm.xlu1 %4015, %v2608_v29   ;;  %2640 = vperm.xlu0 %4014, %v2606_v30   ;;  %v2611_v33 = vld [vmem:[%s4376_s21 + $0x28] sm:$0xff]  ;;  %v2612_v35 = vld [vmem:[%s4376_s21 + $0x30] sm:$0xff]  ;;  %v2614_v37 = vld [vmem:[%s4376_s21 + $0x40] sm:$0xff] }
 0x2d2   : > { %v2615_v36 = vld [vmem:[%s4376_s21 + $0x48] sm:$0xff]  ;;  %v2617_v39 = vld [vmem:[%s4376_s21 + $0x58] sm:$0xff]  ;;  %v2616_v40 = vld [vmem:[%s4376_s21 + $0x50] sm:$0xff] }
 0x2d3   : > { %v2619_v41 = vld [vmem:[%s4376_s21 + $0x68] sm:$0xff]  ;;  %v2618_v42 = vld [vmem:[%s4376_s21 + $0x60] sm:$0xff]  ;;  %v2621_v43 = vld [vmem:[%s4376_s21 + $0x78] sm:$0xff] }
 0x2d4   : > { %v2620_v44 = vld [vmem:[%s4376_s21 + $0x70] sm:$0xff]  ;;  %v2623_v45 = vld [vmem:[%s4376_s21 + $0x88] sm:$0xff]  ;;  %v2622_v46 = vld [vmem:[%s4376_s21 + $0x80] sm:$0xff] }
 0x2d5   : > { %2655 = vperm.xlu1 %4015, %v2609_v16   ;;  %2645 = vperm.xlu0 %4014, %v2607_v32   ;;  %v2625_v48 = vld [vmem:[%s4376_s21 + $0x98] sm:$0xff]  ;;  %v2624_v49 = vld [vmem:[%s4376_s21 + $0x90] sm:$0xff]  ;;  %v2627_v50 = vld [vmem:[%s4376_s21 + $0xa8] sm:$0xff] }
 0x2d6   : > { %v2626_v51 = vld [vmem:[%s4376_s21 + $0xa0] sm:$0xff]  ;;  %v2629_v52 = vld [vmem:[%s4376_s21 + $0xb8] sm:$0xff]  ;;  %v2628_v53 = vld [vmem:[%s4376_s21 + $0xb0] sm:$0xff] }
 0x2d7   : > { %v2631_v54 = vld [vmem:[%s4376_s21 + $0xc8] sm:$0xff]  ;;  %v2630_v55 = vld [vmem:[%s4376_s21 + $0xc0] sm:$0xff]  ;;  %v2633_v56 = vld [vmem:[%s4376_s21 + $0xd8] sm:$0xff] }
 0x2d8   : > { %v2632_v57 = vld [vmem:[%s4376_s21 + $0xd0] sm:$0xff]  ;;  %v2635_v58 = vld [vmem:[%s4376_s21 + $0xe8] sm:$0xff]  ;;  %v2634_v59 = vld [vmem:[%s4376_s21 + $0xe0] sm:$0xff] }
 0x2d9   : > { %2665 = vperm.xlu1 %4015, %v2611_v33   ;;  %2660 = vperm.xlu0 %4014, %v2610_v22   ;;  %v2637_v60 = vld [vmem:[%s4376_s21 + $0xf8] sm:$0xff]  ;;  %v2636_v12 = vld [vmem:[%s4376_s21 + $0xf0] sm:$0xff]  ;;  %v4805_v38 = vld [vmem:[#allocation6] ss:$0 sm:$0xff] }
 0x2da   : > { %v2505_v28 = vld [vmem:[%s4366_s15 + $0x10] sm:$0xff]  ;;  %v2503_v61 = vld [vmem:[%s4366_s15] sm:$0xff]  ;;  %v2506_v0 = vld [vmem:[%s4366_s15 + $0x18] sm:$0xff] }
 0x2db   : > { %v2544_v62 = vadd.f32 %v4805_v38, %v2505_v28  ;;  %v2542_v63 = vadd.f32 %v4805_v38, %v2503_v61  ;;  %v2504_v1 = vld [vmem:[%s4366_s15 + $0x8] sm:$0xff]  ;;  %v2545_v2 = vadd.f32 %v4805_v38, %v2506_v0  ;;  %v2507_v7 = vld [vmem:[%s4366_s15 + $0x20] sm:$0xff]  ;;  %v2832_v8 = vld [vmem:[#allocation2 + $0xd8] sm:$0xff] }
 0x2dc   : > { %v2543_v5 = vadd.f32 %v4805_v38, %v2504_v1  ;;  %v2508_v6 = vld [vmem:[%s4366_s15 + $0x28] sm:$0xff]  ;;  %v2830_v10 = vld [vmem:[#allocation2 + $0xb0] sm:$0xff]  ;;  %v2546_v18 = vadd.f32 %v4805_v38, %v2507_v7  ;;  %v2510_v19 = vld [vmem:[%s4366_s15 + $0x38] sm:$0xff] }
 0x2dd   : > { %2675 = vperm.xlu1 %4015, %v2613_v34   ;;  %2670 = vperm.xlu0 %4014, %v2612_v35   ;;  %v2576_v3 = vmax.f32 %v2544_v62, 0.0  ;;  %v2574_v4 = vmax.f32 %v2542_v63, 0.0  ;;  %v2577_v13 = vmax.f32 %v2545_v2, 0.0  ;;  %v2547_v47 = vadd.f32 %v4805_v38, %v2508_v6  ;;  %v2509_v20 = vld [vmem:[%s4366_s15 + $0x30] sm:$0xff]  ;;  %v2833_v24 = vld [vmem:[#allocation2 + $0x18] sm:$0xff]  ;;  %v2831_v26 = vld [vmem:[#allocation2] sm:$0xff] }
 0x2de   : > { %v2575_v17 = vmax.f32 %v2543_v5, 0.0  ;;  %v2549_v30 = vadd.f32 %v4805_v38, %v2510_v19  ;;  %v2578_v32 = vmax.f32 %v2546_v18, 0.0  ;;  %v2548_v33 = vadd.f32 %v4805_v38, %v2509_v20  ;;  %v2512_v22 = vld [vmem:[%s4366_s15 + $0x48] sm:$0xff]  ;;  %v2511_v34 = vld [vmem:[%s4366_s15 + $0x40] sm:$0xff] }
 0x2df   : > { %v2579_v29 = vmax.f32 %v2547_v47, 0.0  ;;  %v2516_v61 = vld [vmem:[%s4366_s15 + $0x68] sm:$0xff]  ;;  %v2515_v62 = vld [vmem:[%s4366_s15 + $0x60] sm:$0xff] }
 0x2e0   : > { %v2839_v1 = vld [vmem:[#allocation2 + $0x88] sm:$0xff]  ;;  %v2555_v5 = vadd.f32 %v4805_v38, %v2516_v61  ;;  %v2554_v6 = vadd.f32 %v4805_v38, %v2515_v62 }
 0x2e1   : > { %2685 = vperm.xlu1 %4015, %v2615_v36   ;;  %2680 = vperm.xlu0 %4014, %v2614_v37   ;;  %v2835_v37 = vld [vmem:[#allocation2 + $0x68] sm:$0xff] }
 0x2e2   : > { %v2840_v18 = vld [vmem:[#allocation2 + $0xe8] sm:$0xff]  ;;  %v2587_v20 = vmax.f32 %v2555_v5, 0.0  ;;  %v2525_v5 = vld [vmem:[%s4366_s15 + $0xb0] sm:$0xff] }
 0x2e5   : > { %2695 = vperm.xlu1 %4015, %v2617_v39   ;;  %2690 = vperm.xlu0 %4014, %v2616_v40   ;;  %v2834_v40 = vld [vmem:[#allocation2 + $0x50] sm:$0xff] }
 0x2e9   : > { %2705 = vperm.xlu1 %4015, %v2619_v41   ;;  %2700 = vperm.xlu0 %4014, %v2618_v42   ;;  %v2581_v42 = vmax.f32 %v2549_v30, 0.0 }
 0x2ed   : > { %2715 = vperm.xlu1 %4015, %v2621_v43   ;;  %2710 = vperm.xlu0 %4014, %v2620_v44   ;;  %v2551_v43 = vadd.f32 %v4805_v38, %v2512_v22 }
 0x2f1   : > { %2725 = vperm.xlu1 %4015, %v2623_v45   ;;  %2720 = vperm.xlu0 %4014, %v2622_v46   ;;  %v2580_v46 = vmax.f32 %v2548_v33, 0.0  ;;  %v2842_v33 = vld [vmem:[#allocation2 + $0x60] sm:$0xff] }
 0x2f5   : > { %2735 = vperm.xlu1 %4015, %v2625_v48   ;;  %2730 = vperm.xlu0 %4014, %v2624_v49   ;;  %v2550_v48 = vadd.f32 %v4805_v38, %v2511_v34  ;;  %v2514_v49 = vld [vmem:[%s4366_s15 + $0x58] sm:$0xff] }
 0x2f9   : > { %2745 = vperm.xlu1 %4015, %v2627_v50   ;;  %2740 = vperm.xlu0 %4014, %v2626_v51   ;;  %v2513_v50 = vld [vmem:[%s4366_s15 + $0x50] sm:$0xff] }
 0x2fa   : > { %v2552_v28 = vadd.f32 %v4805_v38, %v2513_v50 }
 0x2fd   : > { %2755 = vperm.xlu1 %4015, %v2629_v52   ;;  %2750 = vperm.xlu0 %4014, %v2628_v53   ;;  %v2837_v53 = vld [vmem:[#allocation2 + $0x48] sm:$0xff] }
 0x301   : > { %2765 = vperm.xlu1 %4015, %v2631_v54   ;;  %2760 = vperm.xlu0 %4014, %v2630_v55   ;;  %v2836_v55 = vld [vmem:[#allocation2 + $0x30] sm:$0xff] }
 0x305   : > { %2775 = vperm.xlu1 %4015, %v2633_v56   ;;  %2770 = vperm.xlu0 %4014, %v2632_v57   ;;  %v2583_v57 = vmax.f32 %v2551_v43, 0.0 }
 0x309   : > { %2785 = vperm.xlu1 %4015, %v2635_v58   ;;  %2780 = vperm.xlu0 %4014, %v2634_v59   ;;  %v2553_v58 = vadd.f32 %v4805_v38, %v2514_v49 }
 0x30d   : > { %2795 = vperm.xlu1 %4015, %v2637_v60   ;;  %2790 = vperm.xlu0 %4014, %v2636_v12   ;;  %v2582_v12 = vmax.f32 %v2550_v48, 0.0  ;;  %v2844_v48 = vld [vmem:[#allocation2 + $0x8] sm:$0xff] }
 0x34c   : > { %v2651_v9 = vpop.permute.xlu1 %2650  ;;  %v2641_v11 = vpop.permute.xlu0 %2640 }
 0x34d   : > { %v2800_v14 = vmul.f32 %v2651_v9, %v2576_v3  ;;  %v2798_v15 = vmul.f32 %v2641_v11, %v2574_v4  ;;  %v2838_v3 = vld [vmem:[#allocation2 + $0x80] sm:$0xff]  ;;  %v2585_v9 = vmax.f32 %v2553_v58, 0.0  ;;  %v2518_v11 = vld [vmem:[%s4366_s15 + $0x78] sm:$0xff] }
 0x34f   : > { %v2864_v21 = vadd.f32 %v2832_v8, %v2800_v14  ;;  %v2862_v23 = vadd.f32 %v2830_v10, %v2798_v15  ;;  %v2584_v10 = vmax.f32 %v2552_v28, 0.0  ;;  %v2841_v15 = vld [vmem:[#allocation2 + $0xb8] sm:$0xff] }
 0x350   : > { %v2656_v25 = vpop.permute.xlu1 %2655  ;;  %v2646_v27 = vpop.permute.xlu0 %2645  ;;  %v2846_v28 = vld [vmem:[#allocation2 + $0x38] sm:$0xff] }
 0x351   : > { %2896 = vst [vmem:[%s4379_s13 + $0x10] sm:$0xff] %v2864_v21  ;;  %2894 = vst [vmem:[%s4379_s13] sm:$0xff] %v2862_v23  ;;  %v2801_v31 = vmul.f32 %v2656_v25, %v2577_v13  ;;  %v2799_v16 = vmul.f32 %v2646_v27, %v2575_v17  ;;  %v2517_v13 = vld [vmem:[%s4366_s15 + $0x70] sm:$0xff]  ;;  %v2586_v21 = vmax.f32 %v2554_v6, 0.0  ;;  %v2557_v25 = vadd.f32 %v4805_v38, %v2518_v11  ;;  %v2520_v27 = vld [vmem:[%s4366_s15 + $0x88] sm:$0xff] }
 0x352   : > { %v2559_v34 = vadd.f32 %v4805_v38, %v2520_v27 }
 0x353   : > { %v2865_v35 = vadd.f32 %v2833_v24, %v2801_v31  ;;  %v2863_v36 = vadd.f32 %v2831_v26, %v2799_v16  ;;  %v2556_v26 = vadd.f32 %v4805_v38, %v2517_v13  ;;  %v2843_v16 = vld [vmem:[#allocation2 + $0xf0] sm:$0xff] }
 0x354   : > { %v2666_v39 = vpop.permute.xlu1 %2665  ;;  %v2661_v41 = vpop.permute.xlu0 %2660  ;;  %v2591_v50 = vmax.f32 %v2559_v34, 0.0  ;;  %v2529_v34 = vld [vmem:[%s4366_s15 + $0xd0] sm:$0xff] }
 0x355   : > { %2897 = vst [vmem:[%s4379_s13 + $0x18] sm:$0xff] %v2865_v35  ;;  %2895 = vst [vmem:[%s4379_s13 + $0x8] sm:$0xff] %v2863_v36  ;;  %v2803_v44 = vmul.f32 %v2666_v39, %v2579_v29  ;;  %v2802_v45 = vmul.f32 %v2661_v41, %v2578_v32  ;;  %v2519_v29 = vld [vmem:[%s4366_s15 + $0x80] sm:$0xff]  ;;  %v2589_v39 = vmax.f32 %v2557_v25, 0.0  ;;  %v2522_v41 = vld [vmem:[%s4366_s15 + $0x98] sm:$0xff] }
 0x356   : > { %v2558_v35 = vadd.f32 %v4805_v38, %v2519_v29 }
 0x357   : > { %v2867_v51 = vadd.f32 %v2835_v37, %v2803_v44  ;;  %v2866_v52 = vadd.f32 %v2834_v40, %v2802_v45  ;;  %v2588_v40 = vmax.f32 %v2556_v26, 0.0  ;;  %v2845_v45 = vld [vmem:[#allocation2 + $0x78] sm:$0xff]  ;;  %v2850_v26 = vld [vmem:[#allocation2 + $0xe0] sm:$0xff] }
 0x358   : > { %v2676_v54 = vpop.permute.xlu1 %2675  ;;  %v2671_v56 = vpop.permute.xlu0 %2670 }
 0x359   : > { %2899 = vst [vmem:[%s4379_s13 + $0x28] sm:$0xff] %v2867_v51  ;;  %2898 = vst [vmem:[%s4379_s13 + $0x20] sm:$0xff] %v2866_v52  ;;  %v2805_v59 = vmul.f32 %v2676_v54, %v2581_v42  ;;  %v2804_v60 = vmul.f32 %v2671_v56, %v2580_v46  ;;  %v2521_v42 = vld [vmem:[%s4366_s15 + $0x90] sm:$0xff]  ;;  %v2590_v51 = vmax.f32 %v2558_v35, 0.0  ;;  %v2561_v54 = vadd.f32 %v4805_v38, %v2522_v41  ;;  %v2524_v56 = vld [vmem:[%s4366_s15 + $0xa8] sm:$0xff] }
 0x35a   : > { %v2563_v62 = vadd.f32 %v4805_v38, %v2524_v56 }
 0x35b   : > { %v2869_v63 = vadd.f32 %v2837_v53, %v2805_v59  ;;  %v2868_v0 = vadd.f32 %v2836_v55, %v2804_v60  ;;  %v2560_v55 = vadd.f32 %v4805_v38, %v2521_v42  ;;  %v2847_v60 = vld [vmem:[#allocation2 + $0x58] sm:$0xff] }
 0x35c   : > { %v2686_v2 = vpop.permute.xlu1 %2685  ;;  %v2681_v4 = vpop.permute.xlu0 %2680  ;;  %v2595_v13 = vmax.f32 %v2563_v62, 0.0  ;;  %v2533_v62 = vld [vmem:[%s4366_s15 + $0xf0] sm:$0xff] }
 0x35d   : > { %2901 = vst [vmem:[%s4379_s13 + $0x38] sm:$0xff] %v2869_v63  ;;  %2900 = vst [vmem:[%s4379_s13 + $0x30] sm:$0xff] %v2868_v0  ;;  %v2807_v7 = vmul.f32 %v2686_v2, %v2583_v57  ;;  %v2806_v8 = vmul.f32 %v2681_v4, %v2582_v12  ;;  %v2523_v57 = vld [vmem:[%s4366_s15 + $0xa0] sm:$0xff]  ;;  %v2593_v2 = vmax.f32 %v2561_v54, 0.0  ;;  %v2526_v4 = vld [vmem:[%s4366_s15 + $0xb8] sm:$0xff] }
 0x35e   : > { %v2562_v63 = vadd.f32 %v4805_v38, %v2523_v57 }
 0x35f   : > { %v2871_v47 = vadd.f32 %v2839_v1, %v2807_v7  ;;  %v2870_v14 = vadd.f32 %v2838_v3, %v2806_v8  ;;  %v2592_v3 = vmax.f32 %v2560_v55, 0.0  ;;  %v2849_v8 = vld [vmem:[#allocation2 + $0xc8] sm:$0xff] }
 0x360   : > { %v2696_v17 = vpop.permute.xlu1 %2695  ;;  %v2691_v19 = vpop.permute.xlu0 %2690  ;;  %v2854_v55 = vld [vmem:[#allocation2 + $0xa8] sm:$0xff] }
 0x361   : > { %2903 = vst [vmem:[%s4379_s13 + $0x48] sm:$0xff] %v2871_v47  ;;  %2902 = vst [vmem:[%s4379_s13 + $0x40] sm:$0xff] %v2870_v14  ;;  %v2809_v23 = vmul.f32 %v2696_v17, %v2585_v9  ;;  %v2808_v24 = vmul.f32 %v2691_v19, %v2584_v10  ;;  %v2848_v10 = vld [vmem:[#allocation2 + $0x40] sm:$0xff]  ;;  %v2594_v47 = vmax.f32 %v2562_v63, 0.0  ;;  %v2565_v17 = vadd.f32 %v4805_v38, %v2526_v4  ;;  %v2528_v19 = vld [vmem:[%s4366_s15 + $0xc8] sm:$0xff] }
 0x362   : > { %v2567_v29 = vadd.f32 %v4805_v38, %v2528_v19 }
 0x363   : > { %v2873_v30 = vadd.f32 %v2841_v15, %v2809_v23  ;;  %v2872_v31 = vadd.f32 %v2840_v18, %v2808_v24  ;;  %v2564_v18 = vadd.f32 %v4805_v38, %v2525_v5  ;;  %v2851_v24 = vld [vmem:[#allocation2 + $0x90] sm:$0xff] }
 0x364   : > { %v2706_v32 = vpop.permute.xlu1 %2705  ;;  %v2701_v22 = vpop.permute.xlu0 %2700  ;;  %v2599_v42 = vmax.f32 %v2567_v29, 0.0 }
 0x365   : > { %2905 = vst [vmem:[%s4379_s13 + $0x58] sm:$0xff] %v2873_v30  ;;  %2904 = vst [vmem:[%s4379_s13 + $0x50] sm:$0xff] %v2872_v31  ;;  %v2811_v36 = vmul.f32 %v2706_v32, %v2587_v20  ;;  %v2810_v37 = vmul.f32 %v2701_v22, %v2586_v21  ;;  %v2527_v20 = vld [vmem:[%s4366_s15 + $0xc0] sm:$0xff]  ;;  %v2597_v32 = vmax.f32 %v2565_v17, 0.0  ;;  %v2530_v22 = vld [vmem:[%s4366_s15 + $0xd8] sm:$0xff] }
 0x366   : > { %v2566_v30 = vadd.f32 %v4805_v38, %v2527_v20 }
 0x367   : > { %v2875_v43 = vadd.f32 %v2843_v16, %v2811_v36  ;;  %v2874_v44 = vadd.f32 %v2842_v33, %v2810_v37  ;;  %v2596_v33 = vmax.f32 %v2564_v18, 0.0  ;;  %v2853_v37 = vld [vmem:[#allocation2 + $0xc0] sm:$0xff] }
 0x368   : > { %v2716_v46 = vpop.permute.xlu1 %2715  ;;  %v2711_v49 = vpop.permute.xlu0 %2710 }
 0x369   : > { %2907 = vst [vmem:[%s4379_s13 + $0x68] sm:$0xff] %v2875_v43  ;;  %2906 = vst [vmem:[%s4379_s13 + $0x60] sm:$0xff] %v2874_v44  ;;  %v2813_v52 = vmul.f32 %v2716_v46, %v2589_v39  ;;  %v2812_v53 = vmul.f32 %v2711_v49, %v2588_v40  ;;  %v2852_v40 = vld [vmem:[#allocation2 + $0x70] sm:$0xff]  ;;  %v2598_v43 = vmax.f32 %v2566_v30, 0.0  ;;  %v2569_v46 = vadd.f32 %v4805_v38, %v2530_v22  ;;  %v2532_v49 = vld [vmem:[%s4366_s15 + $0xe8] sm:$0xff] }
 0x36a   : > { %v2571_v57 = vadd.f32 %v4805_v38, %v2532_v49 }
 0x36b   : > { %v2877_v58 = vadd.f32 %v2845_v45, %v2813_v52  ;;  %v2876_v59 = vadd.f32 %v2844_v48, %v2812_v53  ;;  %v2568_v48 = vadd.f32 %v4805_v38, %v2529_v34  ;;  %v2855_v53 = vld [vmem:[#allocation2 + $0xd0] sm:$0xff] }
 0x36c   : > { %v2726_v12 = vpop.permute.xlu1 %2725  ;;  %v2721_v61 = vpop.permute.xlu0 %2720  ;;  %v2603_v5 = vmax.f32 %v2571_v57, 0.0 }
 0x36d   : > { %2909 = vst [vmem:[%s4379_s13 + $0x78] sm:$0xff] %v2877_v58  ;;  %2908 = vst [vmem:[%s4379_s13 + $0x70] sm:$0xff] %v2876_v59  ;;  %v2815_v0 = vmul.f32 %v2726_v12, %v2591_v50  ;;  %v2814_v1 = vmul.f32 %v2721_v61, %v2590_v51  ;;  %v2531_v50 = vld [vmem:[%s4366_s15 + $0xe0] sm:$0xff]  ;;  %v2601_v12 = vmax.f32 %v2569_v46, 0.0  ;;  %v2534_v61 = vld [vmem:[%s4366_s15 + $0xf8] sm:$0xff] }
 0x36e   : > { %v2570_v58 = vadd.f32 %v4805_v38, %v2531_v50 }
 0x36f   : > { %v2879_v6 = vadd.f32 %v2847_v60, %v2815_v0  ;;  %v2878_v7 = vadd.f32 %v2846_v28, %v2814_v1  ;;  %v2600_v28 = vmax.f32 %v2568_v48, 0.0  ;;  %v2857_v1 = vld [vmem:[#allocation2 + $0x28] sm:$0xff] }
 0x370   : > { %v2736_v9 = vpop.permute.xlu1 %2735  ;;  %v2731_v11 = vpop.permute.xlu0 %2730 }
 0x371   : > { %2911 = vst [vmem:[%s4379_s13 + $0x88] sm:$0xff] %v2879_v6  ;;  %2910 = vst [vmem:[%s4379_s13 + $0x80] sm:$0xff] %v2878_v7  ;;  %v2817_v14 = vmul.f32 %v2736_v9, %v2593_v2  ;;  %v2816_v15 = vmul.f32 %v2731_v11, %v2592_v3  ;;  %v2856_v3 = vld [vmem:[#allocation2 + $0x10] sm:$0xff]  ;;  %v2602_v6 = vmax.f32 %v2570_v58, 0.0  ;;  %v2573_v9 = vadd.f32 %v4805_v38, %v2534_v61 }
 0x373   : > { %v2881_v21 = vadd.f32 %v2849_v8, %v2817_v14  ;;  %v2880_v23 = vadd.f32 %v2848_v10, %v2816_v15  ;;  %v2572_v10 = vadd.f32 %v4805_v38, %v2533_v62  ;;  %v2858_v15 = vld [vmem:[#allocation2 + $0xa0] sm:$0xff]  ;;  %v2605_v20 = vmax.f32 %v2573_v9, 0.0 }
 0x374   : > { %v2746_v25 = vpop.permute.xlu1 %2745  ;;  %v2741_v27 = vpop.permute.xlu0 %2740 }
 0x375   : > { %2913 = vst [vmem:[%s4379_s13 + $0x98] sm:$0xff] %v2881_v21  ;;  %2912 = vst [vmem:[%s4379_s13 + $0x90] sm:$0xff] %v2880_v23  ;;  %v2819_v31 = vmul.f32 %v2746_v25, %v2595_v13  ;;  %v2818_v16 = vmul.f32 %v2741_v27, %v2594_v47  ;;  %v2859_v47 = vld [vmem:[#allocation2 + $0xf8] sm:$0xff]  ;;  %v2604_v21 = vmax.f32 %v2572_v10, 0.0 }
 0x376   : > { %v2861_v25 = vld [vmem:[#allocation2 + $0x98] sm:$0xff] }
 0x377   : > { %v2883_v35 = vadd.f32 %v2851_v24, %v2819_v31  ;;  %v2882_v36 = vadd.f32 %v2850_v26, %v2818_v16  ;;  %v2860_v26 = vld [vmem:[#allocation2 + $0x20] sm:$0xff] }
 0x378   : > { %v2756_v39 = vpop.permute.xlu1 %2755  ;;  %v2751_v41 = vpop.permute.xlu0 %2750 }
 0x379   : > { %2915 = vst [vmem:[%s4379_s13 + $0xa8] sm:$0xff] %v2883_v35  ;;  %2914 = vst [vmem:[%s4379_s13 + $0xa0] sm:$0xff] %v2882_v36  ;;  %v2821_v44 = vmul.f32 %v2756_v39, %v2597_v32  ;;  %v2820_v45 = vmul.f32 %v2751_v41, %v2596_v33 }
 0x37b   : > { %v2885_v51 = vadd.f32 %v2853_v37, %v2821_v44  ;;  %v2884_v52 = vadd.f32 %v2852_v40, %v2820_v45 }
 0x37c   : > { %v2766_v54 = vpop.permute.xlu1 %2765  ;;  %v2761_v56 = vpop.permute.xlu0 %2760 }
 0x37d   : > { %2917 = vst [vmem:[%s4379_s13 + $0xb8] sm:$0xff] %v2885_v51  ;;  %2916 = vst [vmem:[%s4379_s13 + $0xb0] sm:$0xff] %v2884_v52  ;;  %v2823_v59 = vmul.f32 %v2766_v54, %v2599_v42  ;;  %v2822_v60 = vmul.f32 %v2761_v56, %v2598_v43 }
 0x37f   : > { %v2887_v63 = vadd.f32 %v2855_v53, %v2823_v59  ;;  %v2886_v0 = vadd.f32 %v2854_v55, %v2822_v60 }
 0x380   : > { %v2776_v2 = vpop.permute.xlu1 %2775  ;;  %v2771_v4 = vpop.permute.xlu0 %2770 }
 0x381   : > { %2919 = vst [vmem:[%s4379_s13 + $0xc8] sm:$0xff] %v2887_v63  ;;  %2918 = vst [vmem:[%s4379_s13 + $0xc0] sm:$0xff] %v2886_v0  ;;  %v2825_v7 = vmul.f32 %v2776_v2, %v2601_v12  ;;  %v2824_v8 = vmul.f32 %v2771_v4, %v2600_v28 }
 0x383   : > { %v2889_v11 = vadd.f32 %v2857_v1, %v2825_v7  ;;  %v2888_v13 = vadd.f32 %v2856_v3, %v2824_v8 }
 0x384   : > { %v2786_v14 = vpop.permute.xlu1 %2785  ;;  %v2781_v17 = vpop.permute.xlu0 %2780 }
 0x385   : > { %2921 = vst [vmem:[%s4379_s13 + $0xd8] sm:$0xff] %v2889_v11  ;;  %2920 = vst [vmem:[%s4379_s13 + $0xd0] sm:$0xff] %v2888_v13  ;;  %v2827_v18 = vmul.f32 %v2786_v14, %v2603_v5  ;;  %v2826_v19 = vmul.f32 %v2781_v17, %v2602_v6 }
 0x387   : > { %v2891_v23 = vadd.f32 %v2859_v47, %v2827_v18  ;;  %v2890_v24 = vadd.f32 %v2858_v15, %v2826_v19 }
 0x388   : > { %v2796_v38 = vpop.permute.xlu1 %2795  ;;  %v2791_v27 = vpop.permute.xlu0 %2790 }
 0x389   : > { %2923 = vst [vmem:[%s4379_s13 + $0xe8] sm:$0xff] %v2891_v23  ;;  %2922 = vst [vmem:[%s4379_s13 + $0xe0] sm:$0xff] %v2890_v24  ;;  %v2829_v29 = vmul.f32 %v2796_v38, %v2605_v20  ;;  %v2828_v30 = vmul.f32 %v2791_v27, %v2604_v21 }
 0x38b   : > { %v2893_v31 = vadd.f32 %v2861_v25, %v2829_v29  ;;  %v2892_v16 = vadd.f32 %v2860_v26, %v2828_v30 }
 0x38d   : > { %2925 = vst [vmem:[%s4379_s13 + $0xf8] sm:$0xff] %v2893_v31  ;;  %2924 = vst [vmem:[%s4379_s13 + $0xf0] sm:$0xff] %v2892_v16 }
 0x38e PF: > { %s3379_s19 = sshll.u32 %s4148_s20, 12  ;;  %s2940_s26 = sshll.u32 %s4379_s13, 4  ;;  %s4909_s26 = int_to_ptr.vmem [resolvable:$true] %s2940_s26 }
 0x38f   : > { %s4906_s14 = scalar_lea.hbm %s4972_s9, %s3379_s19  ;;  %s4996_s25 = sand.u32 1, %s4136_s17  }
 0x390   : > { %s4913_s10 = scalar_lea.sflag [#allocation8], %s4996_s25  ;;  %s4062_s23 = scalar_lea.vmem %s4909_s26, 4096 }
 0x391   : > { %p4063_p3 = scmp.ne.s32.totalorder %s4909_s26, %s4062_s23  ;;  %s4169_s20 = smov [#allocation9]  }
 0x392   : > { %s4066_s29 = sshll.u32 %s4169_s20, 4  ;;  %s4067_s29 = int_to_ptr.vmem [resolvable:$false] %s4066_s29 }
 0x393   : > { %p4064_p4 = pnand %p4063_p3, %p4278_p8  ;;  %s4068_s27 = scalar_lea.vmem %s4067_s29, 8192 }
 0x394   : > { %p4069_p6 = scmp.lt.s32.totalorder %s4909_s26, %s4067_s29  ;;  %p4070_p7 = scmp.lt.s32.totalorder %s4068_s27, %s4062_s23 }
 0x395   : > { %p4065_p5 = pneg %p4064_p4 }
 0x396   : > { %p4071_p9 = por %p4070_p7, %p4069_p6 }
 0x398   : > { %p4072_p10 = pnand %p4071_p9, %p4065_p5 }
 0x39a   : > { %4075 = shalt.err (!%p4072_p10)
}
 0x39b   : > { %s4076_s24 = scalar_lea.hbm %s4906_s14, 4096  ;;  %s4080_s13 = scalar_lea.hbm %s4972_s9, 8192 }
 0x39c   : > { %p4077_p11 = scmp.ne.s32.totalorder %s4906_s14, %s4076_s24  ;;  %p4081_p0 = scmp.lt.s32.totalorder %s4906_s14, %s4972_s9 }
 0x39d   : > { %p4082_p1 = scmp.lt.s32.totalorder %s4080_s13, %s4076_s24 }
 0x39e   : > { %p4078_p12 = pnand %p4077_p11, %p4278_p8 }
 0x39f   : > { %p4083_p2 = por %p4082_p1, %p4081_p0 }
 0x3a0   : > { %p4079_p13 = pneg %p4078_p12 }
 0x3a2   : > { %p4084_p3 = pnand %p4083_p2, %p4079_p13 }
 0x3a4   : > { %4087 = shalt.err (!%p4084_p3)
}
 0x3a5   : > { %s4170_s18 = smov 128   ;;  %s4171_s11 = smov 8  }
 0x3a6   : > { %3926 = dma.vmem_to_hbm [thread:$0]  (%p4278_p8), %s4909_s26, 4096, %s4906_s14, %s4913_s10, %s4170_s18, %s4170_s18, %s4171_s11  }
 0x3a7 PF: > { %s4997_s8 = sld [smem:[#allocation18_spill]]  ;;  %p3938_p4 = scmp.ge.s32.totalorder %s4160_s1, 2 }
 0x3a8   : > { %s2955_s19 = sand.u32 1, %s4132_s0  }
 0x3a9   : > { %s2956_s16 = scalar_lea.sflag [#allocation8], %s2955_s19 }
 0x3ad   : > { %p4998_p5 = scmp.ne.s32.totalorder %s4997_s8, 0 }
 0x3af   : > { %p3933_p6 = pnand %p3938_p4, %p4998_p5 }
 0x3b1   : > { %p3934_p7 = pneg %p3933_p6 }
 0x3b3   : > { %4127 = dma.done.wait (%p3934_p7), %s2956_s16, 4096  }
 0x3b4   : > { %4129 = vsyncadd (%p3934_p7), %s2956_s16, 4294963200  ;;  %s31_s1 = sadd.s32 1, %s4160_s1   ;;  %s4999_s15 = sld [smem:[#allocation13_spill]] }
 0x3b5   : > { %p28_p9 = scmp.ge.s32.totalorder %s31_s1, 6   ;;  %s5000_s18 = sld [smem:[#allocation19_spill]] }
 0x3b6   : > { %s5001_s19 = sld [smem:[#allocation14_spill]]  ;;  %s5005_s0 = smov %s4136_s17 }
 0x3b7   : > { %s5002_s20 = sld [smem:[#allocation15_spill]]  ;;  %30 = sbr.rel (!%p28_p9) target bundleno = 22 (0x16), region = 115 }
 0x3b8   : > { %s5003_s21 = sld [smem:[#allocation16_spill]] }
 0x3b9   : > { %s5004_s22 = sld [smem:[#allocation17_spill]] }
 0x3ba   : > { %s5006_s17 = smov %s4999_s15 }
 0x3bc   :  { %2961 = vsyncpa [#allocation7], 1 }
 0x3bd   :  { %2963 = vsyncpa [#allocation7 + $0x1], 1 }
 0x3be   :  { %2964 = vsyncpa [#allocation8], 1 }
 0x3bf   :  { %2966 = vsyncpa [#allocation8 + $0x1], 1 }

</bundles_post_ra>
